<compile_context>
chip_gen: v7x
topology: tpu7x:2x2x1
jax: 0.10.0
libtpu: 0.0.40
codegen_flags: <defaults>
</compile_context>

<pallas_src>
import functools

import jax
import jax.numpy as jnp
from jax.experimental import pallas as pl
from jax.experimental.pallas import tpu as pltpu


# ----------------------------- helpers --------------------------------------


def _round_up(x, m):
    return ((x + m - 1) // m) * m


def _layer_norm(v, w, b, eps=1e-5):
    mu = jnp.mean(v, axis=-1, keepdims=True)
    var = jnp.mean(jnp.square(v - mu), axis=-1, keepdims=True)
    return (v - mu) * jax.lax.rsqrt(var + eps) * w + b


def _layer_vmem_budget(S, D, I, H):
    """Advisory VMEM budget (bytes) for one encoder-layer pallas_call."""
    hd = D // H
    hd_pad = max(hd, 128)                       # lane padding of head-split tensors
    bf16, f32 = 2, 4
    weights = (3 * H * D * hd_pad + H * hd_pad * D + 2 * D * I) * bf16
    acts = (4 * H * S * hd_pad + H * S * D + 3 * H * S * S) * f32 + H * S * D * bf16
    io = 4 * S * D * f32 + S * S * f32 + S * I * f32
    need = 2 * weights + acts + io + (8 << 20)  # x2 weights: double-buffering headroom
    return int(min(need, 100 * 1024 * 1024))


# ----------------------------- Pallas kernels ------------------------------


def _clip_layer_kernel(x_ref, mask_ref,
                       ln1w_ref, ln1b_ref,
                       wq_ref, bq_ref, wk_ref, bk_ref, wv_ref, bv_ref,
                       wo_ref, bo_ref,
                       ln2w_ref, ln2b_ref,
                       w1_ref, b1_ref, w2_ref, b2_ref,
                       o_ref, *, num_heads):
    """One CLIP text encoder layer for a single batch element (block = (1, S, D))."""
    S, D = x_ref.shape[1], x_ref.shape[2]
    hd = D // num_heads
    scale = float(hd) ** -0.5

    x = x_ref[0].astype(jnp.float32)                                # (S, D) residual, f32

    # ---- causal self-attention block (pre-LN) ----
    h = _layer_norm(x, ln1w_ref[0], ln1b_ref[0])
    hb = jnp.broadcast_to(h.astype(jnp.bfloat16)[None], (num_heads, S, D))

    # head-batched projections: (H,S,D) @ (H,D,hd) -> (H,S,hd); bf16 in, f32 accumulate
    q = jnp.einsum("hsd,hdf->hsf", hb, wq_ref[...],
                   preferred_element_type=jnp.float32) + bq_ref[...]
    k = jnp.einsum("hsd,hdf->hsf", hb, wk_ref[...],
                   preferred_element_type=jnp.float32) + bk_ref[...]
    v = jnp.einsum("hsd,hdf->hsf", hb, wv_ref[...],
                   preferred_element_type=jnp.float32) + bv_ref[...]
    q = q * scale

    s = jnp.einsum("hqf,hkf->hqk", q.astype(jnp.bfloat16), k.astype(jnp.bfloat16),
                   preferred_element_type=jnp.float32)              # (H, S, S)
    s = s + mask_ref[...][None]                                     # hoisted causal mask
    s = s - jnp.max(s, axis=-1, keepdims=True)
    p = jnp.exp(s)
    p = p * pl.reciprocal(jnp.sum(p, axis=-1, keepdims=True), approx=True)

    ctx = jnp.einsum("hqk,hkf->hqf", p.astype(jnp.bfloat16), v.astype(jnp.bfloat16),
                     preferred_element_type=jnp.float32)            # (H, S, hd)

    # out-projection per head, summed over heads: (H,S,hd) @ (H,hd,D) -> sum_h -> (S,D)
    attn = jnp.sum(
        jnp.einsum("hqf,hfd->hqd", ctx.astype(jnp.bfloat16), wo_ref[...],
                   preferred_element_type=jnp.float32),
        axis=0) + bo_ref[0]
    x = x + attn

    # ---- MLP block (pre-LN, quick-GELU) ----
    h2 = _layer_norm(x, ln2w_ref[0], ln2b_ref[0])
    f = jnp.dot(h2.astype(jnp.bfloat16), w1_ref[...],
                preferred_element_type=jnp.float32) + b1_ref[0]
    f = f * jax.nn.sigmoid(1.702 * f)                               # quick_gelu (f32)
    f = jnp.dot(f.astype(jnp.bfloat16), w2_ref[...],
                preferred_element_type=jnp.float32) + b2_ref[0]
    x = x + f

    o_ref[0] = x.astype(o_ref.dtype)


def _final_ln_kernel(x_ref, w_ref, b_ref, o_ref):
    x = x_ref[0].astype(jnp.float32)
    o_ref[0] = _layer_norm(x, w_ref[0], b_ref[0]).astype(o_ref.dtype)


# ------------------------------ wrappers ------------------------------------


def _prepare_layer(lp, num_heads):
    """Convert checkpoint-layout f32 weights into kernel layout (head-split, bf16)."""
    D = lp["wq"].shape[0]
    hd = D // num_heads

    def split_w(w):      # (D_in, D_out) -> (H, D_in, hd)
        return jnp.transpose(w.reshape(D, num_heads, hd), (1, 0, 2)).astype(jnp.bfloat16)

    def split_b(b):      # (1, D) -> (H, 1, hd)
        return b.reshape(num_heads, 1, hd).astype(jnp.float32)

    return {
        "ln1_w": lp["ln1_w"], "ln1_b": lp["ln1_b"],
        "wq": split_w(lp["wq"]), "bq": split_b(lp["bq"]),
        "wk": split_w(lp["wk"]), "bk": split_b(lp["bk"]),
        "wv": split_w(lp["wv"]), "bv": split_b(lp["bv"]),
        "wo": lp["wo"].reshape(num_heads, hd, D).astype(jnp.bfloat16),   # (H, hd, D)
        "bo": lp["bo"],
        "ln2_w": lp["ln2_w"], "ln2_b": lp["ln2_b"],
        "w1": lp["w1"].astype(jnp.bfloat16), "b1": lp["b1"],
        "w2": lp["w2"].astype(jnp.bfloat16), "b2": lp["b2"],
    }


def run_clip_layer(x, mask, lp, *, num_heads):
    """x: (B, S, D) float32 (S already padded); mask: (S, S) f32; lp: kernel-layout params."""
    B, S, D = x.shape
    I = lp["w1"].shape[1]

    x_spec = pl.BlockSpec((1, S, D), lambda b: (b, 0, 0))
    full2 = lambda a: pl.BlockSpec(a.shape, lambda b: (0, 0))
    full3 = lambda a: pl.BlockSpec(a.shape, lambda b: (0, 0, 0))

    kernel = functools.partial(_clip_layer_kernel, num_heads=num_heads)
    return pl.pallas_call(
        kernel,
        out_shape=jax.ShapeDtypeStruct((B, S, D), jnp.float32),
        grid=(B,),
        in_specs=[
            x_spec,
            full2(mask),
            full2(lp["ln1_w"]), full2(lp["ln1_b"]),
            full3(lp["wq"]), full3(lp["bq"]),
            full3(lp["wk"]), full3(lp["bk"]),
            full3(lp["wv"]), full3(lp["bv"]),
            full3(lp["wo"]), full2(lp["bo"]),
            full2(lp["ln2_w"]), full2(lp["ln2_b"]),
            full2(lp["w1"]), full2(lp["b1"]),
            full2(lp["w2"]), full2(lp["b2"]),
        ],
        out_specs=x_spec,
        compiler_params=pltpu.CompilerParams(
            dimension_semantics=("parallel",),
            vmem_limit_bytes=_layer_vmem_budget(S, D, I, num_heads),
        ),
    )(x, mask,
      lp["ln1_w"], lp["ln1_b"],
      lp["wq"], lp["bq"], lp["wk"], lp["bk"], lp["wv"], lp["bv"],
      lp["wo"], lp["bo"],
      lp["ln2_w"], lp["ln2_b"],
      lp["w1"], lp["b1"], lp["w2"], lp["b2"])


def run_final_ln(x, w, b):
    B, S, D = x.shape
    x_spec = pl.BlockSpec((1, S, D), lambda i: (i, 0, 0))
    vec = pl.BlockSpec((1, D), lambda i: (0, 0))
    return pl.pallas_call(
        _final_ln_kernel,
        out_shape=jax.ShapeDtypeStruct((B, S, D), jnp.float32),
        grid=(B,),
        in_specs=[x_spec, vec, vec],
        out_specs=x_spec,
        compiler_params=pltpu.CompilerParams(dimension_semantics=("parallel",)),
    )(x, w, b)


def clip_embedder_forward(tok_out, params, *, num_heads):
    """Mirrors CLIPEmbedder.forward((input_ids, cross_cond_padding))."""
    input_ids, cross_cond_padding = tok_out
    B, S = input_ids.shape

    # sequence padded to a sublane/lane friendly length (real CLIP: 77 -> 128).
    S_pad = _round_up(S, 128) if S > 64 else _round_up(S, 8)

    # embeddings (glue: gather) + zero-pad along the sequence axis
    x = params["tok_emb"][input_ids] + params["pos_emb"][None, :S, :]
    x = x.astype(jnp.float32)
    if S_pad != S:
        x = jnp.pad(x, ((0, 0), (0, S_pad - S), (0, 0)))

    # additive causal mask, built once (hoisted out of kernels and the layer loop)
    idx = jnp.arange(S_pad)
    mask = jnp.where(idx[None, :] > idx[:, None], -1e9, 0.0).astype(jnp.float32)

    # transformer encoder layers (Pallas hot path)
    layers = [_prepare_layer(lp, num_heads) for lp in params["layers"]]
    for lp in layers:
        x = run_clip_layer(x, mask, lp, num_heads=num_heads)

    hidden_states_last = x[:, :S]                                   # pre final-LN
    last_hidden_state = run_final_ln(x, params["lnf_w"], params["lnf_b"])[:, :S]

    # pooler: EOT token = argmax of input_ids (highest token id in CLIP vocab)
    eot = jnp.argmax(input_ids, axis=-1)
    pooler_output = last_hidden_state[jnp.arange(B), eot]           # (B, D)

    return hidden_states_last, cross_cond_padding, pooler_output


# ------------------------------ param init ----------------------------------


def init_params(key, *, vocab, max_pos, D, I, n_layers):
    keys = jax.random.split(key, 4 + n_layers)
    params = {
        "tok_emb": 0.02 * jax.random.normal(keys[0], (vocab, D), jnp.float32),
        "pos_emb": 0.02 * jax.random.normal(keys[1], (max_pos, D), jnp.float32),
        "lnf_w": jnp.ones((1, D), jnp.float32),
        "lnf_b": jnp.zeros((1, D), jnp.float32),
        "layers": [],
    }
    for li in range(n_layers):
        lk = jax.random.split(keys[4 + li], 6)
        layer = {
            "ln1_w": jnp.ones((1, D), jnp.float32),
            "ln1_b": jnp.zeros((1, D), jnp.float32),
            "wq": 0.02 * jax.random.normal(lk[0], (D, D), jnp.float32),
            "bq": jnp.zeros((1, D), jnp.float32),
            "wk": 0.02 * jax.random.normal(lk[1], (D, D), jnp.float32),
            "bk": jnp.zeros((1, D), jnp.float32),
            "wv": 0.02 * jax.random.normal(lk[2], (D, D), jnp.float32),
            "bv": jnp.zeros((1, D), jnp.float32),
            "wo": 0.02 * jax.random.normal(lk[3], (D, D), jnp.float32),
            "bo": jnp.zeros((1, D), jnp.float32),
            "ln2_w": jnp.ones((1, D), jnp.float32),
            "ln2_b": jnp.zeros((1, D), jnp.float32),
            "w1": 0.02 * jax.random.normal(lk[4], (D, I), jnp.float32),
            "b1": jnp.zeros((1, I), jnp.float32),
            "w2": 0.02 * jax.random.normal(lk[5], (I, D), jnp.float32),
            "b2": jnp.zeros((1, D), jnp.float32),
        }
        params["layers"].append(layer)
    return params


# --------------------------------- main --------------------------------------


if __name__ == "__main__":
    # small synthetic CLIP text config (real one: vocab=49408, D=768, 12 layers, 12 heads)
    B, S = 2, 8
    D, I = 64, 128
    N_HEADS, N_LAYERS = 4, 2
    VOCAB, MAX_POS = 100, 16

    key = jax.random.PRNGKey(0)
    k_ids, k_pad, k_params = jax.random.split(key, 3)

    input_ids = jax.random.randint(k_ids, (B, S), 0, VOCAB, dtype=jnp.int32)
    cross_cond_padding = (jax.random.uniform(k_pad, (B, S)) > 0.5).astype(jnp.float32)

    params = init_params(k_params, vocab=VOCAB, max_pos=MAX_POS, D=D, I=I,
                         n_layers=N_LAYERS)

    hidden_last, padding_out, pooled = clip_embedder_forward(
        (input_ids, cross_cond_padding), params, num_heads=N_HEADS)

    jax.block_until_ready((hidden_last, padding_out, pooled))

    assert hidden_last.shape == (B, S, D)
    assert padding_out.shape == (B, S)
    assert pooled.shape == (B, D)
    print("KERNEL_OK")
</pallas_src>

<mosaic_0001>
module attributes {stable_mosaic.version = 11 : i64} {
  func.func @_clip_layer_kernel(%arg0: i32, %arg1: memref<1x8x64xf32, #tpu.memory_space<vmem>>, %arg2: memref<8x8xf32, #tpu.memory_space<vmem>>, %arg3: memref<1x64xf32, #tpu.memory_space<vmem>>, %arg4: memref<1x64xf32, #tpu.memory_space<vmem>>, %arg5: memref<4x64x16xbf16, #tpu.memory_space<vmem>>, %arg6: memref<4x1x16xf32, #tpu.memory_space<vmem>>, %arg7: memref<4x64x16xbf16, #tpu.memory_space<vmem>>, %arg8: memref<4x1x16xf32, #tpu.memory_space<vmem>>, %arg9: memref<4x64x16xbf16, #tpu.memory_space<vmem>>, %arg10: memref<4x1x16xf32, #tpu.memory_space<vmem>>, %arg11: memref<4x16x64xbf16, #tpu.memory_space<vmem>>, %arg12: memref<1x64xf32, #tpu.memory_space<vmem>>, %arg13: memref<1x64xf32, #tpu.memory_space<vmem>>, %arg14: memref<1x64xf32, #tpu.memory_space<vmem>>, %arg15: memref<64x128xbf16, #tpu.memory_space<vmem>>, %arg16: memref<1x128xf32, #tpu.memory_space<vmem>>, %arg17: memref<128x64xbf16, #tpu.memory_space<vmem>>, %arg18: memref<1x64xf32, #tpu.memory_space<vmem>>, %arg19: memref<1x8x64xf32, #tpu.memory_space<vmem>>) attributes {dimension_semantics = [#tpu.dimension_semantics<parallel>], iteration_bounds = array<i64: 2>, scalar_prefetch = 0 : i64, scratch_operands = 0 : i64, tpu.core_type = #tpu.core_type<tc>, window_params = [{transform_indices = @transform_0, window_bounds = array<i64: 1, 8, 64>}, {pipeline_mode = #tpu.pipeline_mode<synchronous>, transform_indices = @transform_1, window_bounds = array<i64: 8, 8>}, {pipeline_mode = #tpu.pipeline_mode<synchronous>, transform_indices = @transform_2, window_bounds = array<i64: 1, 64>}, {pipeline_mode = #tpu.pipeline_mode<synchronous>, transform_indices = @transform_3, window_bounds = array<i64: 1, 64>}, {pipeline_mode = #tpu.pipeline_mode<synchronous>, transform_indices = @transform_4, window_bounds = array<i64: 4, 64, 16>}, {pipeline_mode = #tpu.pipeline_mode<synchronous>, transform_indices = @transform_5, window_bounds = array<i64: 4, 1, 16>}, {pipeline_mode = #tpu.pipeline_mode<synchronous>, transform_indices = @transform_6, window_bounds = array<i64: 4, 64, 16>}, {pipeline_mode = #tpu.pipeline_mode<synchronous>, transform_indices = @transform_7, window_bounds = array<i64: 4, 1, 16>}, {pipeline_mode = #tpu.pipeline_mode<synchronous>, transform_indices = @transform_8, window_bounds = array<i64: 4, 64, 16>}, {pipeline_mode = #tpu.pipeline_mode<synchronous>, transform_indices = @transform_9, window_bounds = array<i64: 4, 1, 16>}, {pipeline_mode = #tpu.pipeline_mode<synchronous>, transform_indices = @transform_10, window_bounds = array<i64: 4, 16, 64>}, {pipeline_mode = #tpu.pipeline_mode<synchronous>, transform_indices = @transform_11, window_bounds = array<i64: 1, 64>}, {pipeline_mode = #tpu.pipeline_mode<synchronous>, transform_indices = @transform_12, window_bounds = array<i64: 1, 64>}, {pipeline_mode = #tpu.pipeline_mode<synchronous>, transform_indices = @transform_13, window_bounds = array<i64: 1, 64>}, {pipeline_mode = #tpu.pipeline_mode<synchronous>, transform_indices = @transform_14, window_bounds = array<i64: 64, 128>}, {pipeline_mode = #tpu.pipeline_mode<synchronous>, transform_indices = @transform_15, window_bounds = array<i64: 1, 128>}, {pipeline_mode = #tpu.pipeline_mode<synchronous>, transform_indices = @transform_16, window_bounds = array<i64: 128, 64>}, {pipeline_mode = #tpu.pipeline_mode<synchronous>, transform_indices = @transform_17, window_bounds = array<i64: 1, 64>}, {transform_indices = @transform_18, window_bounds = array<i64: 1, 8, 64>}]} {
    %c0 = arith.constant 0 : index
    %c0_0 = arith.constant 0 : index
    %c0_1 = arith.constant 0 : index
    %0 = vector.load %arg1[%c0, %c0_0, %c0_1] : memref<1x8x64xf32, #tpu.memory_space<vmem>>, vector<1x8x64xf32>
    %1 = vector.shape_cast %0 : vector<1x8x64xf32> to vector<8x64xf32>
    %c0_2 = arith.constant 0 : index
    %c0_3 = arith.constant 0 : index
    %2 = vector.load %arg3[%c0_2, %c0_3] : memref<1x64xf32, #tpu.memory_space<vmem>>, vector<1x64xf32>
    %3 = vector.shape_cast %2 : vector<1x64xf32> to vector<64xf32>
    %c0_4 = arith.constant 0 : index
    %c0_5 = arith.constant 0 : index
    %4 = vector.load %arg4[%c0_4, %c0_5] : memref<1x64xf32, #tpu.memory_space<vmem>>, vector<1x64xf32>
    %5 = vector.shape_cast %4 : vector<1x64xf32> to vector<64xf32>
    %cst = arith.constant dense<0.000000e+00> : vector<8xf32>
    %6 = vector.multi_reduction <add>, %1, %cst [1] : vector<8x64xf32> to vector<8xf32>
    %7 = vector.shape_cast %6 : vector<8xf32> to vector<8x1xf32>
    %cst_6 = arith.constant 6.400000e+01 : f32
    %8 = vector.broadcast %cst_6 : f32 to vector<8x1xf32>
    %9 = arith.divf %7, %8 : vector<8x1xf32>
    %10 = vector.broadcast %9 : vector<8x1xf32> to vector<8x64xf32>
    %11 = arith.subf %1, %10 : vector<8x64xf32>
    %12 = arith.mulf %11, %11 : vector<8x64xf32>
    %cst_7 = arith.constant dense<0.000000e+00> : vector<8xf32>
    %13 = vector.multi_reduction <add>, %12, %cst_7 [1] : vector<8x64xf32> to vector<8xf32>
    %14 = vector.shape_cast %13 : vector<8xf32> to vector<8x1xf32>
    %cst_8 = arith.constant 6.400000e+01 : f32
    %15 = vector.broadcast %cst_8 : f32 to vector<8x1xf32>
    %16 = arith.divf %14, %15 : vector<8x1xf32>
    %17 = vector.broadcast %9 : vector<8x1xf32> to vector<8x64xf32>
    %18 = arith.subf %1, %17 : vector<8x64xf32>
    %cst_9 = arith.constant 9.99999974E-6 : f32
    %19 = vector.broadcast %cst_9 : f32 to vector<8x1xf32>
    %20 = arith.addf %16, %19 : vector<8x1xf32>
    %21 = math.rsqrt %20 : vector<8x1xf32>
    %22 = vector.broadcast %21 : vector<8x1xf32> to vector<8x64xf32>
    %23 = arith.mulf %18, %22 : vector<8x64xf32>
    %24 = vector.shape_cast %3 : vector<64xf32> to vector<1x64xf32>
    %25 = vector.broadcast %24 : vector<1x64xf32> to vector<8x64xf32>
    %26 = arith.mulf %23, %25 : vector<8x64xf32>
    %27 = vector.shape_cast %5 : vector<64xf32> to vector<1x64xf32>
    %28 = vector.broadcast %27 : vector<1x64xf32> to vector<8x64xf32>
    %29 = arith.addf %26, %28 : vector<8x64xf32>
    %30 = arith.truncf %29 : vector<8x64xf32> to vector<8x64xbf16>
    %31 = vector.shape_cast %30 : vector<8x64xbf16> to vector<1x8x64xbf16>
    %32 = vector.shape_cast %31 : vector<1x8x64xbf16> to vector<1x8x64xbf16>
    %33 = vector.broadcast %32 : vector<1x8x64xbf16> to vector<4x8x64xbf16>
    %c0_10 = arith.constant 0 : index
    %c0_11 = arith.constant 0 : index
    %c0_12 = arith.constant 0 : index
    %34 = vector.load %arg5[%c0_10, %c0_11, %c0_12] : memref<4x64x16xbf16, #tpu.memory_space<vmem>>, vector<4x64x16xbf16>
    "tpu.trace_start"() <{level = 10 : i32, message = "hsd,hdf->hsf"}> : () -> ()
    %cst_13 = arith.constant dense<0.000000e+00> : vector<4x8x16xf32>
    %35 = tpu.matmul %33, %34, %cst_13 {dimension_numbers = #tpu.dot_dimension_numbers<[2], [1], [1], [2], [0, 0, 0, 1, 1, 2], [0], [0]>} : vector<4x8x64xbf16>, vector<4x64x16xbf16>, vector<4x8x16xf32> -> vector<4x8x16xf32>
    "tpu.trace_stop"() : () -> ()
    %c0_14 = arith.constant 0 : index
    %c0_15 = arith.constant 0 : index
    %c0_16 = arith.constant 0 : index
    %36 = vector.load %arg6[%c0_14, %c0_15, %c0_16] : memref<4x1x16xf32, #tpu.memory_space<vmem>>, vector<4x1x16xf32>
    %37 = vector.broadcast %36 : vector<4x1x16xf32> to vector<4x8x16xf32>
    %38 = arith.addf %35, %37 : vector<4x8x16xf32>
    %c0_17 = arith.constant 0 : index
    %c0_18 = arith.constant 0 : index
    %c0_19 = arith.constant 0 : index
    %39 = vector.load %arg7[%c0_17, %c0_18, %c0_19] : memref<4x64x16xbf16, #tpu.memory_space<vmem>>, vector<4x64x16xbf16>
    "tpu.trace_start"() <{level = 10 : i32, message = "hsd,hdf->hsf"}> : () -> ()
    %cst_20 = arith.constant dense<0.000000e+00> : vector<4x8x16xf32>
    %40 = tpu.matmul %33, %39, %cst_20 {dimension_numbers = #tpu.dot_dimension_numbers<[2], [1], [1], [2], [0, 0, 0, 1, 1, 2], [0], [0]>} : vector<4x8x64xbf16>, vector<4x64x16xbf16>, vector<4x8x16xf32> -> vector<4x8x16xf32>
    "tpu.trace_stop"() : () -> ()
    %c0_21 = arith.constant 0 : index
    %c0_22 = arith.constant 0 : index
    %c0_23 = arith.constant 0 : index
    %41 = vector.load %arg8[%c0_21, %c0_22, %c0_23] : memref<4x1x16xf32, #tpu.memory_space<vmem>>, vector<4x1x16xf32>
    %42 = vector.broadcast %41 : vector<4x1x16xf32> to vector<4x8x16xf32>
    %43 = arith.addf %40, %42 : vector<4x8x16xf32>
    %c0_24 = arith.constant 0 : index
    %c0_25 = arith.constant 0 : index
    %c0_26 = arith.constant 0 : index
    %44 = vector.load %arg9[%c0_24, %c0_25, %c0_26] : memref<4x64x16xbf16, #tpu.memory_space<vmem>>, vector<4x64x16xbf16>
    "tpu.trace_start"() <{level = 10 : i32, message = "hsd,hdf->hsf"}> : () -> ()
    %cst_27 = arith.constant dense<0.000000e+00> : vector<4x8x16xf32>
    %45 = tpu.matmul %33, %44, %cst_27 {dimension_numbers = #tpu.dot_dimension_numbers<[2], [1], [1], [2], [0, 0, 0, 1, 1, 2], [0], [0]>} : vector<4x8x64xbf16>, vector<4x64x16xbf16>, vector<4x8x16xf32> -> vector<4x8x16xf32>
    "tpu.trace_stop"() : () -> ()
    %c0_28 = arith.constant 0 : index
    %c0_29 = arith.constant 0 : index
    %c0_30 = arith.constant 0 : index
    %46 = vector.load %arg10[%c0_28, %c0_29, %c0_30] : memref<4x1x16xf32, #tpu.memory_space<vmem>>, vector<4x1x16xf32>
    %47 = vector.broadcast %46 : vector<4x1x16xf32> to vector<4x8x16xf32>
    %48 = arith.addf %45, %47 : vector<4x8x16xf32>
    %cst_31 = arith.constant 2.500000e-01 : f32
    %49 = vector.broadcast %cst_31 : f32 to vector<4x8x16xf32>
    %50 = arith.mulf %38, %49 : vector<4x8x16xf32>
    %51 = arith.truncf %50 : vector<4x8x16xf32> to vector<4x8x16xbf16>
    %52 = arith.truncf %43 : vector<4x8x16xf32> to vector<4x8x16xbf16>
    "tpu.trace_start"() <{level = 10 : i32, message = "hqf,hkf->hqk"}> : () -> ()
    %cst_32 = arith.constant dense<0.000000e+00> : vector<4x8x8xf32>
    %53 = tpu.matmul %51, %52, %cst_32 {dimension_numbers = #tpu.dot_dimension_numbers<[2], [2], [1], [1], [0, 0, 0, 1, 1, 1], [0], [0]>} : vector<4x8x16xbf16>, vector<4x8x16xbf16>, vector<4x8x8xf32> -> vector<4x8x8xf32>
    "tpu.trace_stop"() : () -> ()
    %c0_33 = arith.constant 0 : index
    %c0_34 = arith.constant 0 : index
    %54 = vector.load %arg2[%c0_33, %c0_34] : memref<8x8xf32, #tpu.memory_space<vmem>>, vector<8x8xf32>
    %55 = vector.shape_cast %54 : vector<8x8xf32> to vector<1x8x8xf32>
    %56 = vector.broadcast %55 : vector<1x8x8xf32> to vector<4x8x8xf32>
    %57 = arith.addf %53, %56 : vector<4x8x8xf32>
    %cst_35 = arith.constant dense<0xFF800000> : vector<4x8xf32>
    %58 = vector.multi_reduction <maximumf>, %57, %cst_35 [2] : vector<4x8x8xf32> to vector<4x8xf32>
    %59 = vector.shape_cast %58 : vector<4x8xf32> to vector<4x8x1xf32>
    %60 = vector.broadcast %59 : vector<4x8x1xf32> to vector<4x8x8xf32>
    %61 = arith.subf %57, %60 : vector<4x8x8xf32>
    %62 = math.exp %61 : vector<4x8x8xf32>
    %cst_36 = arith.constant dense<0.000000e+00> : vector<4x8xf32>
    %63 = vector.multi_reduction <add>, %62, %cst_36 [2] : vector<4x8x8xf32> to vector<4x8xf32>
    %64 = vector.shape_cast %63 : vector<4x8xf32> to vector<4x8x1xf32>
    %65 = tpu.reciprocal %64 {approx = true} : vector<4x8x1xf32> -> vector<4x8x1xf32>
    %66 = vector.broadcast %65 : vector<4x8x1xf32> to vector<4x8x8xf32>
    %67 = arith.mulf %62, %66 : vector<4x8x8xf32>
    %68 = arith.truncf %67 : vector<4x8x8xf32> to vector<4x8x8xbf16>
    %69 = arith.truncf %48 : vector<4x8x16xf32> to vector<4x8x16xbf16>
    "tpu.trace_start"() <{level = 10 : i32, message = "hqk,hkf->hqf"}> : () -> ()
    %cst_37 = arith.constant dense<0.000000e+00> : vector<4x8x16xf32>
    %70 = tpu.matmul %68, %69, %cst_37 {dimension_numbers = #tpu.dot_dimension_numbers<[2], [1], [1], [2], [0, 0, 0, 1, 1, 2], [0], [0]>} : vector<4x8x8xbf16>, vector<4x8x16xbf16>, vector<4x8x16xf32> -> vector<4x8x16xf32>
    "tpu.trace_stop"() : () -> ()
    %71 = arith.truncf %70 : vector<4x8x16xf32> to vector<4x8x16xbf16>
    %c0_38 = arith.constant 0 : index
    %c0_39 = arith.constant 0 : index
    %c0_40 = arith.constant 0 : index
    %72 = vector.load %arg11[%c0_38, %c0_39, %c0_40] : memref<4x16x64xbf16, #tpu.memory_space<vmem>>, vector<4x16x64xbf16>
    "tpu.trace_start"() <{level = 10 : i32, message = "hqf,hfd->hqd"}> : () -> ()
    %cst_41 = arith.constant dense<0.000000e+00> : vector<4x8x64xf32>
    %73 = tpu.matmul %71, %72, %cst_41 {dimension_numbers = #tpu.dot_dimension_numbers<[2], [1], [1], [2], [0, 0, 0, 1, 1, 2], [0], [0]>} : vector<4x8x16xbf16>, vector<4x16x64xbf16>, vector<4x8x64xf32> -> vector<4x8x64xf32>
    "tpu.trace_stop"() : () -> ()
    %cst_42 = arith.constant dense<0.000000e+00> : vector<8x64xf32>
    %74 = vector.multi_reduction <add>, %73, %cst_42 [0] : vector<4x8x64xf32> to vector<8x64xf32>
    %c0_43 = arith.constant 0 : index
    %c0_44 = arith.constant 0 : index
    %75 = vector.load %arg12[%c0_43, %c0_44] : memref<1x64xf32, #tpu.memory_space<vmem>>, vector<1x64xf32>
    %76 = vector.shape_cast %75 : vector<1x64xf32> to vector<64xf32>
    %77 = vector.shape_cast %76 : vector<64xf32> to vector<1x64xf32>
    %78 = vector.broadcast %77 : vector<1x64xf32> to vector<8x64xf32>
    %79 = arith.addf %74, %78 : vector<8x64xf32>
    %80 = arith.addf %1, %79 : vector<8x64xf32>
    %c0_45 = arith.constant 0 : index
    %c0_46 = arith.constant 0 : index
    %81 = vector.load %arg13[%c0_45, %c0_46] : memref<1x64xf32, #tpu.memory_space<vmem>>, vector<1x64xf32>
    %82 = vector.shape_cast %81 : vector<1x64xf32> to vector<64xf32>
    %c0_47 = arith.constant 0 : index
    %c0_48 = arith.constant 0 : index
    %83 = vector.load %arg14[%c0_47, %c0_48] : memref<1x64xf32, #tpu.memory_space<vmem>>, vector<1x64xf32>
    %84 = vector.shape_cast %83 : vector<1x64xf32> to vector<64xf32>
    %cst_49 = arith.constant dense<0.000000e+00> : vector<8xf32>
    %85 = vector.multi_reduction <add>, %80, %cst_49 [1] : vector<8x64xf32> to vector<8xf32>
    %86 = vector.shape_cast %85 : vector<8xf32> to vector<8x1xf32>
    %cst_50 = arith.constant 6.400000e+01 : f32
    %87 = vector.broadcast %cst_50 : f32 to vector<8x1xf32>
    %88 = arith.divf %86, %87 : vector<8x1xf32>
    %89 = vector.broadcast %88 : vector<8x1xf32> to vector<8x64xf32>
    %90 = arith.subf %80, %89 : vector<8x64xf32>
    %91 = arith.mulf %90, %90 : vector<8x64xf32>
    %cst_51 = arith.constant dense<0.000000e+00> : vector<8xf32>
    %92 = vector.multi_reduction <add>, %91, %cst_51 [1] : vector<8x64xf32> to vector<8xf32>
    %93 = vector.shape_cast %92 : vector<8xf32> to vector<8x1xf32>
    %cst_52 = arith.constant 6.400000e+01 : f32
    %94 = vector.broadcast %cst_52 : f32 to vector<8x1xf32>
    %95 = arith.divf %93, %94 : vector<8x1xf32>
    %96 = vector.broadcast %88 : vector<8x1xf32> to vector<8x64xf32>
    %97 = arith.subf %80, %96 : vector<8x64xf32>
    %cst_53 = arith.constant 9.99999974E-6 : f32
    %98 = vector.broadcast %cst_53 : f32 to vector<8x1xf32>
    %99 = arith.addf %95, %98 : vector<8x1xf32>
    %100 = math.rsqrt %99 : vector<8x1xf32>
    %101 = vector.broadcast %100 : vector<8x1xf32> to vector<8x64xf32>
    %102 = arith.mulf %97, %101 : vector<8x64xf32>
    %103 = vector.shape_cast %82 : vector<64xf32> to vector<1x64xf32>
    %104 = vector.broadcast %103 : vector<1x64xf32> to vector<8x64xf32>
    %105 = arith.mulf %102, %104 : vector<8x64xf32>
    %106 = vector.shape_cast %84 : vector<64xf32> to vector<1x64xf32>
    %107 = vector.broadcast %106 : vector<1x64xf32> to vector<8x64xf32>
    %108 = arith.addf %105, %107 : vector<8x64xf32>
    %109 = arith.truncf %108 : vector<8x64xf32> to vector<8x64xbf16>
    %c0_54 = arith.constant 0 : index
    %c0_55 = arith.constant 0 : index
    %110 = vector.load %arg15[%c0_54, %c0_55] : memref<64x128xbf16, #tpu.memory_space<vmem>>, vector<64x128xbf16>
    %cst_56 = arith.constant dense<0.000000e+00> : vector<8x128xf32>
    %111 = tpu.matmul %109, %110, %cst_56 {dimension_numbers = #tpu.dot_dimension_numbers<[1], [0], [0], [1], [0, 0, 1, 1], [], []>} : vector<8x64xbf16>, vector<64x128xbf16>, vector<8x128xf32> -> vector<8x128xf32>
    %c0_57 = arith.constant 0 : index
    %c0_58 = arith.constant 0 : index
    %112 = vector.load %arg16[%c0_57, %c0_58] : memref<1x128xf32, #tpu.memory_space<vmem>>, vector<1x128xf32>
    %113 = vector.shape_cast %112 : vector<1x128xf32> to vector<128xf32>
    %114 = vector.shape_cast %113 : vector<128xf32> to vector<1x128xf32>
    %115 = vector.broadcast %114 : vector<1x128xf32> to vector<8x128xf32>
    %116 = arith.addf %111, %115 : vector<8x128xf32>
    %cst_59 = arith.constant 1.702000e+00 : f32
    %117 = vector.broadcast %cst_59 : f32 to vector<8x128xf32>
    %118 = arith.mulf %117, %116 : vector<8x128xf32>
    %119 = arith.negf %118 : vector<8x128xf32>
    %120 = math.exp %119 : vector<8x128xf32>
    %cst_60 = arith.constant 1.000000e+00 : f32
    %121 = vector.broadcast %cst_60 : f32 to vector<8x128xf32>
    %122 = arith.addf %121, %120 : vector<8x128xf32>
    %123 = arith.divf %121, %122 : vector<8x128xf32>
    %124 = arith.mulf %116, %123 : vector<8x128xf32>
    %125 = arith.truncf %124 : vector<8x128xf32> to vector<8x128xbf16>
    %c0_61 = arith.constant 0 : index
    %c0_62 = arith.constant 0 : index
    %126 = vector.load %arg17[%c0_61, %c0_62] : memref<128x64xbf16, #tpu.memory_space<vmem>>, vector<128x64xbf16>
    %cst_63 = arith.constant dense<0.000000e+00> : vector<8x64xf32>
    %127 = tpu.matmul %125, %126, %cst_63 {dimension_numbers = #tpu.dot_dimension_numbers<[1], [0], [0], [1], [0, 0, 1, 1], [], []>} : vector<8x128xbf16>, vector<128x64xbf16>, vector<8x64xf32> -> vector<8x64xf32>
    %c0_64 = arith.constant 0 : index
    %c0_65 = arith.constant 0 : index
    %128 = vector.load %arg18[%c0_64, %c0_65] : memref<1x64xf32, #tpu.memory_space<vmem>>, vector<1x64xf32>
    %129 = vector.shape_cast %128 : vector<1x64xf32> to vector<64xf32>
    %130 = vector.shape_cast %129 : vector<64xf32> to vector<1x64xf32>
    %131 = vector.broadcast %130 : vector<1x64xf32> to vector<8x64xf32>
    %132 = arith.addf %127, %131 : vector<8x64xf32>
    %133 = arith.addf %80, %132 : vector<8x64xf32>
    %c0_66 = arith.constant 0 : index
    %c0_67 = arith.constant 0 : index
    %c0_68 = arith.constant 0 : index
    %134 = vector.load %arg19[%c0_66, %c0_67, %c0_68] : memref<1x8x64xf32, #tpu.memory_space<vmem>>, vector<1x8x64xf32>
    %135 = vector.shape_cast %134 : vector<1x8x64xf32> to vector<8x64xf32>
    %136 = vector.shape_cast %133 : vector<8x64xf32> to vector<1x8x64xf32>
    tpu.vector_store %arg19[%c0_66, %c0_67, %c0_68], %136 {strides = array<i32>} : memref<1x8x64xf32, #tpu.memory_space<vmem>>, vector<1x8x64xf32>,
    return
  }
  func.func @transform_0(%arg0: i32) -> (i32, i32, i32) {
    %c0_i32 = arith.constant 0 : i32
    %c0_i32_0 = arith.constant 0 : i32
    %c0_i32_1 = arith.constant 0 : i32
    return %arg0, %c0_i32, %c0_i32_0 : i32, i32, i32
  }
  func.func @transform_1(%arg0: i32) -> (i32, i32) {
    %c0_i32 = arith.constant 0 : i32
    %c0_i32_0 = arith.constant 0 : i32
    %c0_i32_1 = arith.constant 0 : i32
    return %c0_i32, %c0_i32_0 : i32, i32
  }
  func.func @transform_2(%arg0: i32) -> (i32, i32) {
    %c0_i32 = arith.constant 0 : i32
    %c0_i32_0 = arith.constant 0 : i32
    %c0_i32_1 = arith.constant 0 : i32
    return %c0_i32, %c0_i32_0 : i32, i32
  }
  func.func @transform_3(%arg0: i32) -> (i32, i32) {
    %c0_i32 = arith.constant 0 : i32
    %c0_i32_0 = arith.constant 0 : i32
    %c0_i32_1 = arith.constant 0 : i32
    return %c0_i32, %c0_i32_0 : i32, i32
  }
  func.func @transform_4(%arg0: i32) -> (i32, i32, i32) {
    %c0_i32 = arith.constant 0 : i32
    %c0_i32_0 = arith.constant 0 : i32
    %c0_i32_1 = arith.constant 0 : i32
    %c0_i32_2 = arith.constant 0 : i32
    return %c0_i32, %c0_i32_0, %c0_i32_1 : i32, i32, i32
  }
  func.func @transform_5(%arg0: i32) -> (i32, i32, i32) {
    %c0_i32 = arith.constant 0 : i32
    %c0_i32_0 = arith.constant 0 : i32
    %c0_i32_1 = arith.constant 0 : i32
    %c0_i32_2 = arith.constant 0 : i32
    return %c0_i32, %c0_i32_0, %c0_i32_1 : i32, i32, i32
  }
  func.func @transform_6(%arg0: i32) -> (i32, i32, i32) {
    %c0_i32 = arith.constant 0 : i32
    %c0_i32_0 = arith.constant 0 : i32
    %c0_i32_1 = arith.constant 0 : i32
    %c0_i32_2 = arith.constant 0 : i32
    return %c0_i32, %c0_i32_0, %c0_i32_1 : i32, i32, i32
  }
  func.func @transform_7(%arg0: i32) -> (i32, i32, i32) {
    %c0_i32 = arith.constant 0 : i32
    %c0_i32_0 = arith.constant 0 : i32
    %c0_i32_1 = arith.constant 0 : i32
    %c0_i32_2 = arith.constant 0 : i32
    return %c0_i32, %c0_i32_0, %c0_i32_1 : i32, i32, i32
  }
  func.func @transform_8(%arg0: i32) -> (i32, i32, i32) {
    %c0_i32 = arith.constant 0 : i32
    %c0_i32_0 = arith.constant 0 : i32
    %c0_i32_1 = arith.constant 0 : i32
    %c0_i32_2 = arith.constant 0 : i32
    return %c0_i32, %c0_i32_0, %c0_i32_1 : i32, i32, i32
  }
  func.func @transform_9(%arg0: i32) -> (i32, i32, i32) {
    %c0_i32 = arith.constant 0 : i32
    %c0_i32_0 = arith.constant 0 : i32
    %c0_i32_1 = arith.constant 0 : i32
    %c0_i32_2 = arith.constant 0 : i32
    return %c0_i32, %c0_i32_0, %c0_i32_1 : i32, i32, i32
  }
  func.func @transform_10(%arg0: i32) -> (i32, i32, i32) {
    %c0_i32 = arith.constant 0 : i32
    %c0_i32_0 = arith.constant 0 : i32
    %c0_i32_1 = arith.constant 0 : i32
    %c0_i32_2 = arith.constant 0 : i32
    return %c0_i32, %c0_i32_0, %c0_i32_1 : i32, i32, i32
  }
  func.func @transform_11(%arg0: i32) -> (i32, i32) {
    %c0_i32 = arith.constant 0 : i32
    %c0_i32_0 = arith.constant 0 : i32
    %c0_i32_1 = arith.constant 0 : i32
    return %c0_i32, %c0_i32_0 : i32, i32
  }
  func.func @transform_12(%arg0: i32) -> (i32, i32) {
    %c0_i32 = arith.constant 0 : i32
    %c0_i32_0 = arith.constant 0 : i32
    %c0_i32_1 = arith.constant 0 : i32
    return %c0_i32, %c0_i32_0 : i32, i32
  }
  func.func @transform_13(%arg0: i32) -> (i32, i32) {
    %c0_i32 = arith.constant 0 : i32
    %c0_i32_0 = arith.constant 0 : i32
    %c0_i32_1 = arith.constant 0 : i32
    return %c0_i32, %c0_i32_0 : i32, i32
  }
  func.func @transform_14(%arg0: i32) -> (i32, i32) {
    %c0_i32 = arith.constant 0 : i32
    %c0_i32_0 = arith.constant 0 : i32
    %c0_i32_1 = arith.constant 0 : i32
    return %c0_i32, %c0_i32_0 : i32, i32
  }
  func.func @transform_15(%arg0: i32) -> (i32, i32) {
    %c0_i32 = arith.constant 0 : i32
    %c0_i32_0 = arith.constant 0 : i32
    %c0_i32_1 = arith.constant 0 : i32
    return %c0_i32, %c0_i32_0 : i32, i32
  }
  func.func @transform_16(%arg0: i32) -> (i32, i32) {
    %c0_i32 = arith.constant 0 : i32
    %c0_i32_0 = arith.constant 0 : i32
    %c0_i32_1 = arith.constant 0 : i32
    return %c0_i32, %c0_i32_0 : i32, i32
  }
  func.func @transform_17(%arg0: i32) -> (i32, i32) {
    %c0_i32 = arith.constant 0 : i32
    %c0_i32_0 = arith.constant 0 : i32
    %c0_i32_1 = arith.constant 0 : i32
    return %c0_i32, %c0_i32_0 : i32, i32
  }
  func.func @transform_18(%arg0: i32) -> (i32, i32, i32) {
    %c0_i32 = arith.constant 0 : i32
    %c0_i32_0 = arith.constant 0 : i32
    %c0_i32_1 = arith.constant 0 : i32
    return %arg0, %c0_i32, %c0_i32_0 : i32, i32, i32
  }
}

</mosaic_0001>

<bundles_post_ra>
// kernel: tpu_custom_call.1
= control target key start
LH: loop header
LB: loop body
LE: loop exit
PB: predicated region body
PF: predicated region fallthrough
CT: control target
= control target key end

     0   :  { %s3835_s0 = inlined_call_operand.vmem [shape: f32[2,8,64], index: 0, kind: input, shape index: {}]   ;;  %s3836_s1 = inlined_call_operand.vmem [shape: f32[8,8], index: 1, kind: input, shape index: {}]   ;;  %s3837_s2 = inlined_call_operand.vmem [shape: f32[1,64], index: 2, kind: input, shape index: {}]   ;;  %s3838_s3 = inlined_call_operand.vmem [shape: f32[1,64], index: 3, kind: input, shape index: {}]   ;;  %s3839_s4 = inlined_call_operand.vmem [shape: bf16[4,64,16], index: 4, kind: input, shape index: {}]   ;;  %s3840_s5 = inlined_call_operand.vmem [shape: f32[4,1,16], index: 5, kind: input, shape index: {}]   ;;  %s3841_s6 = inlined_call_operand.vmem [shape: bf16[4,64,16], index: 6, kind: input, shape index: {}]   ;;  %s3842_s7 = inlined_call_operand.vmem [shape: f32[4,1,16], index: 7, kind: input, shape index: {}]   ;;  %s3843_s8 = inlined_call_operand.vmem [shape: bf16[4,64,16], index: 8, kind: input, shape index: {}]   ;;  %s3844_s9 = inlined_call_operand.vmem [shape: f32[4,1,16], index: 9, kind: input, shape index: {}]   ;;  %s3845_s10 = inlined_call_operand.vmem [shape: bf16[4,16,64], index: 10, kind: input, shape index: {}]   ;;  %s3846_s11 = inlined_call_operand.vmem [shape: f32[1,64], index: 11, kind: input, shape index: {}]   ;;  %s3847_s12 = inlined_call_operand.vmem [shape: f32[1,64], index: 12, kind: input, shape index: {}]   ;;  %s3848_s13 = inlined_call_operand.vmem [shape: f32[1,64], index: 13, kind: input, shape index: {}]   ;;  %s3849_s14 = inlined_call_operand.vmem [shape: bf16[64,128], index: 14, kind: input, shape index: {}]   ;;  %s3850_s15 = inlined_call_operand.vmem [shape: f32[1,128], index: 15, kind: input, shape index: {}]   ;;  %s3851_s16 = inlined_call_operand.vmem [shape: bf16[128,64], index: 16, kind: input, shape index: {}]   ;;  %s3852_s17 = inlined_call_operand.vmem [shape: f32[1,64], index: 17, kind: input, shape index: {}]   ;;  %s3853_s18 = inlined_call_operand.hbm [shape: f32[2,8,64], index: 18, kind: output, shape index: {}]  }
   0x1   :  { %3858 = sst [smem:[#allocation9_spill]] %s3835_s0 }
   0x2   :  { %3859 = sst [smem:[#allocation10_spill]] %s3836_s1 }
   0x3   :  { %3860 = sst [smem:[#allocation11_spill]] %s3837_s2 }
   0x4   :  { %3861 = sst [smem:[#allocation12_spill]] %s3838_s3 }
   0x5   :  { %23 = vsyncpa [#allocation3], 0 }
   0x6   :  { %25 = vsyncpa [#allocation3 + $0x1], 0  ;;  %s3280_s27 = smov 0   ;;  %s3282_s28 = smov 0  }
   0x7   :  { %s3284_s29 = smov 0   ;;  %s3286_s30 = smov 0  }
   0x8 LB: > { %3862 = sst [smem:[#allocation5_spill]] %s3176_s29  ;;  %s3301_s0 = sadd.s32 4294967295, %s3180_s30   ;;  %s3180_s30 = sphi %s3286_s30, %s3873_s30   ;;  %s3176_s29 = sphi %s3284_s29, %s3875_s29   ;;  %s3172_s28 = sphi %s3282_s28, %s3877_s28   ;;  %s3168_s27 = sphi %s3280_s27, %s3876_s27  }
   0x9   : > { %s2523_s19 = sadd.s32 4294967294, %s3180_s30   ;;  %s3305_s1 = sadd.s32 1, %s3180_s30  }
   0xa   : > { %3863 = sst [smem:[#allocation6_spill]] %s3305_s1  ;;  %s421_s20 = sadd.s32 1, %s3176_s29 }
   0xb   : > { %s418_s21 = ssub.s32 %s3180_s30, %s3305_s1  ;;  %p431_p0 = scmp.ne.s32.totalorder %s3176_s29, %s3172_s28 }
   0xc   : > { %p419_p1 = scmp.eq.s32.totalorder %s418_s21, 0  ;;  %p432_p2 = scmp.eq.s32.totalorder %s3301_s0, 1 }
   0xd   : > { %p437_p3 = scmp.ne.s32.totalorder %s3172_s28, %s3168_s27  ;;  %p438_p4 = scmp.eq.s32.totalorder %s2523_s19, 1 }
   0xe   : > { %s3316_s22 = scalar_select %p419_p1, %s3176_s29, %s421_s20  }
   0xf   : > { %p3318_p5 = por %p432_p2, %p431_p0  ;;  %p3322_p6 = por %p438_p4, %p437_p3 }
  0x10   : > { %3864 = sst [smem:[#allocation7_spill]] %s3316_s22  ;;  %p2526_p7 = scmp.ge.s32.totalorder %s3180_s30, 1 }
  0x11   : > { %s3866_s23 = scalar_select %p3322_p6, 1, 0 }
  0x12   : > { %p514_p8 = scmp.lt.s32.totalorder %s3180_s30, 3 }
  0x13   : > { %3867 = sst [smem:[#allocation8_spill]] %s3866_s23 }
  0x14   : > { %p515_p9 = pnand %p2526_p7, %p514_p8 }
  0x15   : > { %p567_p10 = scmp.lt.s32.totalorder (!%p515_p9), %s3301_s0, 1  ;;  %vm575_vm0 = vcmask (!%p515_p9), 523264   ;;  %s3868_s20 = sld [smem:[#allocation9_spill]] (!%p515_p9)  ;;  %v3029_v7 = vld [vmem:[%s3839_s4] sm:$0xff] (!%p515_p9)   ;;  %v3182_v9 = vmov (!%p515_p9), 0.0   ;;  %v3031_v10 = vld [vmem:[%s3839_s4 + $0x8] sm:$0xff] (!%p515_p9)  }
  0x16   : > { %518 = sbr.rel (%p515_p9) target bundleno = 2378 (0x94a), region = 92  ;;  %v3030_v8 = vld [vmem:[%s3839_s4 + $0x20] sm:$0xff] (!%p515_p9)   ;;  %2740 = vmatprep.subr.bf16.mxu0 (!%p515_p9), %v3182_v9  ;;  %2752 = vmatprep.subr.bf16.mxu1 (!%p515_p9), %v3182_v9  ;;  %v3032_v11 = vld [vmem:[%s3839_s4 + $0x28] sm:$0xff] (!%p515_p9)   ;;  %v3033_v12 = vld [vmem:[%s3839_s4 + $0x10] sm:$0xff] (!%p515_p9)   ;;  %vm3183_vm1 = vmmov (!%p515_p9), 0   ;;  %s3870_s3 = sld [smem:[#allocation12_spill]] (!%p515_p9) }
  0x17   : > { %2741 = vmatpush3.bf16.msra.mxu0 (!%p515_p9), %v3029_v7  ;;  %2753 = vmatpush3.bf16.msra.mxu1 (!%p515_p9), %v3030_v8  ;;  %v3034_v13 = vld [vmem:[%s3839_s4 + $0x30] sm:$0xff] (!%p515_p9)   ;;  %v3035_v14 = vld [vmem:[%s3839_s4 + $0x18] sm:$0xff] (!%p515_p9)   ;;  %v3037_v25 = vld [vmem:[%s3839_s4 + $0x40] sm:$0xff] (!%p515_p9)   ;;  %vm1569_vm2 = vcmask (!%p515_p9), 130048   ;;  %vm1810_vm3 = vcmask (!%p515_p9), 1043456   ;;  %s3871_s26 = sld [smem:[#allocation10_spill]] (!%p515_p9) }
  0x18   : > { %2742 = vmatprep.subr.bf16.mxu0 (!%p515_p9), %v3182_v9  ;;  %2754 = vmatprep.subr.bf16.mxu1 (!%p515_p9), %v3182_v9  ;;  %v3036_v15 = vld [vmem:[%s3839_s4 + $0x38] sm:$0xff] (!%p515_p9)   ;;  %v3038_v26 = vld [vmem:[%s3839_s4 + $0x60] sm:$0xff] (!%p515_p9)   ;;  %v3039_v28 = vld [vmem:[%s3839_s4 + $0x48] sm:$0xff] (!%p515_p9)   ;;  %vm1754_vm4 = vcmask (!%p515_p9), 64512  }
  0x19   : > { %2748 = vmatprep.mubr.msk.bf16.mxu0 (!%p515_p9), %vm3183_vm1, %v3182_v9  ;;  %2760 = vmatprep.mubr.msk.bf16.mxu1 (!%p515_p9), %vm3183_vm1, %v3182_v9  ;;  %v3040_v29 = vld [vmem:[%s3839_s4 + $0x68] sm:$0xff] (!%p515_p9)   ;;  %v3041_v30 = vld [vmem:[%s3839_s4 + $0x50] sm:$0xff] (!%p515_p9)   ;;  %v3043_v32 = vld [vmem:[%s3839_s4 + $0x58] sm:$0xff] (!%p515_p9)  }
  0x1a   : > { %v3042_v31 = vld [vmem:[%s3839_s4 + $0x70] sm:$0xff] (!%p515_p9)   ;;  %v3044_v33 = vld [vmem:[%s3839_s4 + $0x78] sm:$0xff] (!%p515_p9)   ;;  %v3045_v34 = vld [vmem:[%s3841_s6] sm:$0xff] (!%p515_p9)  }
  0x1b   : > { %2743 = vmatpush3.bf16.msra.mxu0 (!%p515_p9), %v3031_v10  ;;  %2755 = vmatpush3.bf16.msra.mxu1 (!%p515_p9), %v3032_v11  ;;  %v3046_v35 = vld [vmem:[%s3841_s6 + $0x20] sm:$0xff] (!%p515_p9)   ;;  %v3047_v36 = vld [vmem:[%s3841_s6 + $0x8] sm:$0xff] (!%p515_p9)   ;;  %v3049_v38 = vld [vmem:[%s3841_s6 + $0x10] sm:$0xff] (!%p515_p9)  }
  0x1c   : > { %2744 = vmatprep.subr.bf16.mxu0 (!%p515_p9), %v3182_v9  ;;  %2756 = vmatprep.subr.bf16.mxu1 (!%p515_p9), %v3182_v9  ;;  %v2530_v22 = vld [vmem:[%s3870_s3] ss:$0 sm:$0xff] (!%p515_p9)  ;;  %v3048_v37 = vld [vmem:[%s3841_s6 + $0x28] sm:$0xff] (!%p515_p9)   ;;  %v3050_v39 = vld [vmem:[%s3841_s6 + $0x30] sm:$0xff] (!%p515_p9)  }
  0x1d   : > { %s568_s24 = scalar_select %p567_p10, %s3301_s0, 1  ;;  %v3051_v40 = vld [vmem:[%s3841_s6 + $0x18] sm:$0xff]   ;;  %v3053_v42 = vld [vmem:[%s3841_s6 + $0x40] sm:$0xff]   ;;  %v3055_v44 = vld [vmem:[%s3841_s6 + $0x48] sm:$0xff]  }
  0x1e   : > { %v3052_v41 = vld [vmem:[%s3841_s6 + $0x38] sm:$0xff]   ;;  %v3054_v43 = vld [vmem:[%s3841_s6 + $0x60] sm:$0xff]   ;;  %v3056_v45 = vld [vmem:[%s3841_s6 + $0x68] sm:$0xff]  }
  0x1f   : > { %s2528_s25 = sshll.u32 %s568_s24, 3  ;;  %2745 = vmatpush3.bf16.msra.mxu0 %v3033_v12  ;;  %2757 = vmatpush3.bf16.msra.mxu1 %v3034_v13  ;;  %s3869_s24 = sld [smem:[#allocation11_spill]]  ;;  %v3057_v46 = vld [vmem:[%s3841_s6 + $0x50] sm:$0xff]   ;;  %v3059_v48 = vld [vmem:[%s3841_s6 + $0x58] sm:$0xff]   ;;  %v3061_v50 = vld [vmem:[%s3843_s8] sm:$0xff]  }
  0x20   : > { %s3333_s21 = scalar_lea.vmem %s3868_s20, %s2528_s25  ;;  %2746 = vmatprep.subr.bf16.mxu0 %v3182_v9  ;;  %2758 = vmatprep.subr.bf16.mxu1 %v3182_v9  ;;  %v3058_v47 = vld [vmem:[%s3841_s6 + $0x70] sm:$0xff]   ;;  %v3060_v49 = vld [vmem:[%s3841_s6 + $0x78] sm:$0xff]   ;;  %v3062_v51 = vld [vmem:[%s3843_s8 + $0x20] sm:$0xff]   ;;  %s564_s25 = sand.u32 1, %s3172_s28  }
  0x21   : > { %v572_v0 = vld [vmem:[%s3333_s21] sm:$0xff]  ;;  %v3063_v52 = vld [vmem:[%s3843_s8 + $0x8] sm:$0xff]   ;;  %v3065_v54 = vld [vmem:[%s3843_s8 + $0x10] sm:$0xff]   ;;  %s2527_s19 = sshll.u32 %s564_s25, 3  ;;  %s2639_s20 = sshll.u32 %s3301_s0, 7 }
  0x22   : > { %v576_v1 = vsel %vm575_vm0, %v572_v0, 0.0  ;;  %v3064_v53 = vld [vmem:[%s3843_s8 + $0x28] sm:$0xff]   ;;  %v3066_v55 = vld [vmem:[%s3843_s8 + $0x30] sm:$0xff]   ;;  %v3067_v56 = vld [vmem:[%s3843_s8 + $0x18] sm:$0xff]   ;;  %s566_s1 = scalar_lea.vmem [#allocation2], %s2527_s19  ;;  %s3792_s23 = scalar_lea.hbm %s3853_s18, %s2639_s20 }
  0x23   : > { %577 = vadd.xlane.f32.xlu0 %v576_v1  ;;  %2747 = vmatpush3.bf16.msra.mxu0 %v3035_v14  ;;  %v3068_v57 = vld [vmem:[%s3843_s8 + $0x38] sm:$0xff]   ;;  %v3069_v58 = vld [vmem:[%s3843_s8 + $0x40] sm:$0xff]   ;;  %v3071_v60 = vld [vmem:[%s3843_s8 + $0x48] sm:$0xff]   ;;  %s2464_s29 = sshll.u32 %s566_s1, 4  ;;  %s2451_s0 = scalar_lea.sflag [#allocation3], %s564_s25  ;;  %s3794_s29 = int_to_ptr.vmem [resolvable:$true] %s2464_s29 }
  0x24   : > { %2759 = vmatpush3.bf16.msra.mxu1 %v3036_v15  ;;  %2764 = vmatprep.subr.bf16.mxu0 %v3182_v9  ;;  %v3070_v59 = vld [vmem:[%s3843_s8 + $0x60] sm:$0xff]   ;;  %v3072_v61 = vld [vmem:[%s3843_s8 + $0x68] sm:$0xff]   ;;  %v3073_v62 = vld [vmem:[%s3843_s8 + $0x50] sm:$0xff]   ;;  %s3118_s19 = scalar_lea.vmem %s3794_s29, 128 }
  0x25   : > { %2776 = vmatprep.subr.bf16.mxu1 %v3182_v9  ;;  %v2529_v20 = vld [vmem:[%s3869_s24] ss:$0 sm:$0xff]  ;;  %v3074_v63 = vld [vmem:[%s3843_s8 + $0x70] sm:$0xff]   ;;  %v3076_v1 = vld [vmem:[%s3843_s8 + $0x78] sm:$0xff]   ;;  %p3119_p11 = scmp.ne.s32.totalorder %s3794_s29, %s3118_s19 }
  0x27   : > { %p3120_p12 = pnand %p3119_p11, %p3318_p5 }
  0x29   : > { %p3121_p13 = pneg %p3120_p12 }
  0xb0   : > { %v578_v2 = vpop.xlane.xlu0 %577 }
  0xb1   : > { %v580_v3 = vmul.f32 0.015625, %v578_v2 }
  0xb3   : > { %v581_v4 = vsub.f32 %v572_v0, %v580_v3  ;;  %v3075_v0 = vld [vmem:[%s3843_s8 + $0x58] sm:$0xff]  }
  0xb5   : > { %v582_v5 = vmul.f32 %v581_v4, %v581_v4 }
  0xb7   : > { %v583_v6 = vsel %vm575_vm0, %v582_v5, 0.0 }
  0xb8   : > { %584 = vadd.xlane.f32.xlu0 %v583_v6 }
 0x145   : > { %v585_v16 = vpop.xlane.xlu0 %584 }
 0x146   : > { %v586_v17 = vmul.f32 0.015625, %v585_v16 }
 0x148   : > { %v587_v18 = vadd.f32 1e-05, %v586_v17 }
 0x14a   : > { %3093 = vrsqrt.f32 %v587_v18 }
 0x154   : > { %v3094_v19 = vpop.eup %3093 }
 0x155   : > { %v589_v21 = vmul.f32 %v3094_v19, %v581_v4  ;;  %v2555_v19 = vld [vmem:[%s3842_s7] ss:$0 sm:$0xff] }
 0x157   : > { %v596_v23 = vmul.f32 %v2529_v20, %v589_v21  ;;  %v2531_v20 = vld [vmem:[%s3840_s5] ss:$0 sm:$0xff] }
 0x159   : > { %v603_v24 = vadd.f32 %v2530_v22, %v596_v23 }
 0x15b   : > { %v3388_v27 = vpack.c.bf16 %v603_v24, %v603_v24 }
 0x15d   : > { %2749 = vmatmul.mubr.msk.bf16.vlgmr.msra.gmra.mrb[0].mxu0 %vm575_vm0, %v3388_v27  ;;  %2761 = vmatmul.mubr.msk.bf16.vlgmr.msra.gmra.mrb[0].mxu1 %vm575_vm0, %v3388_v27 }
 0x15e   : > { %2765 = vmatpush3.bf16.msra.mxu0 %v3037_v25  ;;  %2777 = vmatpush3.bf16.msra.mxu1 %v3038_v26  ;;  %v2556_v26 = vld [vmem:[%s3842_s7 + $0x1] ss:$0 sm:$0xff] }
 0x15f   : > { %2766 = vmatprep.subr.bf16.mxu0 %v3182_v9  ;;  %2778 = vmatprep.subr.bf16.mxu1 %v3182_v9 }
 0x160   : > { %2772 = vmatprep.mubr.msk.bf16.mxu0 %vm3183_vm1, %v3182_v9  ;;  %2784 = vmatprep.mubr.msk.bf16.mxu1 %vm3183_vm1, %v3182_v9 }
 0x162   : > { %2767 = vmatpush3.bf16.msra.mxu0 %v3039_v28  ;;  %2779 = vmatpush3.bf16.msra.mxu1 %v3040_v29 }
 0x163   : > { %2768 = vmatprep.subr.bf16.mxu0 %v3182_v9  ;;  %2780 = vmatprep.subr.bf16.mxu1 %v3182_v9 }
 0x166   : > { %2769 = vmatpush3.bf16.msra.mxu0 %v3041_v30  ;;  %2781 = vmatpush3.bf16.msra.mxu1 %v3042_v31 }
 0x167   : > { %2770 = vmatprep.subr.bf16.mxu0 %v3182_v9  ;;  %2782 = vmatprep.subr.bf16.mxu1 %v3182_v9 }
 0x16a   : > { %2771 = vmatpush3.bf16.msra.mxu0 %v3043_v32  ;;  %2783 = vmatpush3.bf16.msra.mxu1 %v3044_v33 }
 0x16b   : > { %2788 = vmatprep.subr.bf16.mxu0 %v3182_v9  ;;  %2800 = vmatprep.subr.bf16.mxu1 %v3182_v9 }
 0x16d   : > { %2773 = vmatmul.mubr.msk.bf16.vlgmr.msra.gmra.mrb[4].mxu0 %vm575_vm0, %v3388_v27  ;;  %2785 = vmatmul.mubr.msk.bf16.vlgmr.msra.gmra.mrb[4].mxu1 %vm575_vm0, %v3388_v27 }
 0x16e   : > { %2789 = vmatpush3.bf16.msra.mxu0 %v3045_v34  ;;  %2801 = vmatpush3.bf16.msra.mxu1 %v3046_v35 }
 0x16f   : > { %2790 = vmatprep.subr.bf16.mxu0 %v3182_v9  ;;  %2802 = vmatprep.subr.bf16.mxu1 %v3182_v9 }
 0x170   : > { %2796 = vmatprep.mubr.msk.bf16.mxu0 %vm3183_vm1, %v3182_v9  ;;  %2808 = vmatprep.mubr.msk.bf16.mxu1 %vm3183_vm1, %v3182_v9 }
 0x172   : > { %2791 = vmatpush3.bf16.msra.mxu0 %v3047_v36  ;;  %2803 = vmatpush3.bf16.msra.mxu1 %v3048_v37  ;;  %v2532_v36 = vld [vmem:[%s3840_s5 + $0x1] ss:$0 sm:$0xff] }
 0x173   : > { %2792 = vmatprep.subr.bf16.mxu0 %v3182_v9  ;;  %2804 = vmatprep.subr.bf16.mxu1 %v3182_v9 }
 0x176   : > { %2793 = vmatpush3.bf16.msra.mxu0 %v3049_v38  ;;  %2805 = vmatpush3.bf16.msra.mxu1 %v3050_v39 }
 0x177   : > { %2794 = vmatprep.subr.bf16.mxu0 %v3182_v9  ;;  %2806 = vmatprep.subr.bf16.mxu1 %v3182_v9 }
 0x17a   : > { %2795 = vmatpush3.bf16.msra.mxu0 %v3051_v40  ;;  %2807 = vmatpush3.bf16.msra.mxu1 %v3052_v41 }
 0x17b   : > { %2812 = vmatprep.subr.bf16.mxu0 %v3182_v9  ;;  %2824 = vmatprep.subr.bf16.mxu1 %v3182_v9 }
 0x17d   : > { %2797 = vmatmul.mubr.msk.bf16.vlgmr.msra.gmra.mrb[8].mxu0 %vm575_vm0, %v3388_v27  ;;  %2809 = vmatmul.mubr.msk.bf16.vlgmr.msra.gmra.mrb[8].mxu1 %vm575_vm0, %v3388_v27 }
 0x17e   : > { %2813 = vmatpush3.bf16.msra.mxu0 %v3053_v42  ;;  %2825 = vmatpush3.bf16.msra.mxu1 %v3054_v43  ;;  %v2557_v42 = vld [vmem:[%s3842_s7 + $0x2] ss:$0 sm:$0xff]  ;;  %v2558_v43 = vld [vmem:[%s3842_s7 + $0x3] ss:$0 sm:$0xff] }
 0x17f   : > { %2814 = vmatprep.subr.bf16.mxu0 %v3182_v9  ;;  %2826 = vmatprep.subr.bf16.mxu1 %v3182_v9 }
 0x180   : > { %2820 = vmatprep.mubr.msk.bf16.mxu0 %vm3183_vm1, %v3182_v9  ;;  %2832 = vmatprep.mubr.msk.bf16.mxu1 %vm3183_vm1, %v3182_v9 }
 0x182   : > { %2815 = vmatpush3.bf16.msra.mxu0 %v3055_v44  ;;  %2827 = vmatpush3.bf16.msra.mxu1 %v3056_v45  ;;  %v2533_v44 = vld [vmem:[%s3840_s5 + $0x2] ss:$0 sm:$0xff]  ;;  %v2534_v45 = vld [vmem:[%s3840_s5 + $0x3] ss:$0 sm:$0xff] }
 0x183   : > { %2816 = vmatprep.subr.bf16.mxu0 %v3182_v9  ;;  %2828 = vmatprep.subr.bf16.mxu1 %v3182_v9 }
 0x186   : > { %2817 = vmatpush3.bf16.msra.mxu0 %v3057_v46  ;;  %2829 = vmatpush3.bf16.msra.mxu1 %v3058_v47 }
 0x187   : > { %2818 = vmatprep.subr.bf16.mxu0 %v3182_v9  ;;  %2830 = vmatprep.subr.bf16.mxu1 %v3182_v9 }
 0x18a   : > { %2819 = vmatpush3.bf16.msra.mxu0 %v3059_v48  ;;  %2831 = vmatpush3.bf16.msra.mxu1 %v3060_v49 }
 0x18b   : > { %2836 = vmatprep.subr.bf16.mxu0 %v3182_v9  ;;  %2848 = vmatprep.subr.bf16.mxu1 %v3182_v9 }
 0x18d   : > { %2821 = vmatmul.mubr.msk.bf16.vlgmr.msra.gmra.mrb[12].mxu0 %vm575_vm0, %v3388_v27  ;;  %2833 = vmatmul.mubr.msk.bf16.vlgmr.msra.gmra.mrb[12].mxu1 %vm575_vm0, %v3388_v27 }
 0x18e   : > { %2837 = vmatpush3.bf16.msra.mxu0 %v3061_v50  ;;  %2849 = vmatpush3.bf16.msra.mxu1 %v3062_v51 }
 0x18f   : > { %2838 = vmatprep.subr.bf16.mxu0 %v3182_v9  ;;  %2850 = vmatprep.subr.bf16.mxu1 %v3182_v9 }
 0x190   : > { %2844 = vmatprep.mubr.msk.bf16.mxu0 %vm3183_vm1, %v3182_v9  ;;  %2856 = vmatprep.mubr.msk.bf16.mxu1 %vm3183_vm1, %v3182_v9 }
 0x192   : > { %2839 = vmatpush3.bf16.msra.mxu0 %v3063_v52  ;;  %2851 = vmatpush3.bf16.msra.mxu1 %v3064_v53 }
 0x193   : > { %2840 = vmatprep.subr.bf16.mxu0 %v3182_v9  ;;  %2852 = vmatprep.subr.bf16.mxu1 %v3182_v9 }
 0x196   : > { %2841 = vmatpush3.bf16.msra.mxu0 %v3065_v54  ;;  %2853 = vmatpush3.bf16.msra.mxu1 %v3066_v55 }
 0x197   : > { %2842 = vmatprep.subr.bf16.mxu0 %v3182_v9  ;;  %2854 = vmatprep.subr.bf16.mxu1 %v3182_v9 }
 0x19a   : > { %2843 = vmatpush3.bf16.msra.mxu0 %v3067_v56  ;;  %2855 = vmatpush3.bf16.msra.mxu1 %v3068_v57 }
 0x19b   : > { %2860 = vmatprep.subr.bf16.mxu0 %v3182_v9  ;;  %2872 = vmatprep.subr.bf16.mxu1 %v3182_v9 }
 0x19d   : > { %2845 = vmatmul.mubr.msk.bf16.vlgmr.msra.gmra.mrb[16].mxu0 %vm575_vm0, %v3388_v27  ;;  %2857 = vmatmul.mubr.msk.bf16.vlgmr.msra.gmra.mrb[16].mxu1 %vm575_vm0, %v3388_v27 }
 0x19e   : > { %2861 = vmatpush3.bf16.msra.mxu0 %v3069_v58  ;;  %2873 = vmatpush3.bf16.msra.mxu1 %v3070_v59 }
 0x19f   : > { %2862 = vmatprep.subr.bf16.mxu0 %v3182_v9  ;;  %2874 = vmatprep.subr.bf16.mxu1 %v3182_v9 }
 0x1a0   : > { %2868 = vmatprep.mubr.msk.bf16.mxu0 %vm3183_vm1, %v3182_v9  ;;  %2880 = vmatprep.mubr.msk.bf16.mxu1 %vm3183_vm1, %v3182_v9 }
 0x1a2   : > { %2863 = vmatpush3.bf16.msra.mxu0 %v3071_v60  ;;  %2875 = vmatpush3.bf16.msra.mxu1 %v3072_v61 }
 0x1a3   : > { %2864 = vmatprep.subr.bf16.mxu0 %v3182_v9  ;;  %2876 = vmatprep.subr.bf16.mxu1 %v3182_v9 }
 0x1a6   : > { %2865 = vmatpush3.bf16.msra.mxu0 %v3073_v62  ;;  %2877 = vmatpush3.bf16.msra.mxu1 %v3074_v63 }
 0x1a7   : > { %2866 = vmatprep.subr.bf16.mxu0 %v3182_v9  ;;  %2878 = vmatprep.subr.bf16.mxu1 %v3182_v9 }
 0x1aa   : > { %2867 = vmatpush3.bf16.msra.mxu0 %v3075_v0  ;;  %2879 = vmatpush3.bf16.msra.mxu1 %v3076_v1 }
 0x1ab   : > { %2884 = vmatprep.subr.bf16.mxu0 %v3182_v9  ;;  %2902 = vmatprep.subr.bf16.mxu1 %v3182_v9 }
 0x1ad   : > { %2869 = vmatmul.mubr.msk.bf16.vlgmr.msra.gmra.mrb[20].mxu0 %vm575_vm0, %v3388_v27  ;;  %2881 = vmatmul.mubr.msk.bf16.vlgmr.msra.gmra.mrb[20].mxu1 %vm575_vm0, %v3388_v27 }
 0x1ae   : > { %2886 = vmatprep.mubr.msk.bf16.mxu0 %vm3183_vm1, %v3182_v9  ;;  %2904 = vmatprep.mubr.msk.bf16.mxu1 %vm3183_vm1, %v3182_v9 }
 0x230   : > { %v726_v2 = vpop.f32.mrb[0].mxu0  ;;  %v790_v3 = vpop.f32.mrb[0].mxu1 }
 0x231   : > { %v2750_v4 = vpop.f32.mrb[1].mxu0  ;;  %v2762_v5 = vpop.f32.mrb[1].mxu1  ;;  %v727_v29 = vadd.f32 %v2531_v20, %v726_v2  ;;  %v791_v38 = vadd.f32 %v2532_v36, %v790_v3  ;;  %v2579_v3 = vld [vmem:[%s3844_s9] ss:$0 sm:$0xff]  ;;  %v2581_v20 = vld [vmem:[%s3844_s9 + $0x2] ss:$0 sm:$0xff] }
 0x232   : > { %v729_v6 = vpop.f32.mrb[2].mxu0  ;;  %v793_v7 = vpop.f32.mrb[2].mxu1  ;;  %v2580_v4 = vld [vmem:[%s3844_s9 + $0x1] ss:$0 sm:$0xff] }
 0x233   : > { %v2751_v8 = vpop.f32.mrb[3].mxu0  ;;  %v2763_v10 = vpop.f32.mrb[3].mxu1  ;;  %v1556_v35 = vmul.f32 0.25, %v727_v29  ;;  %v1557_v41 = vmul.f32 0.25, %v791_v38  ;;  %v1568_v36 = vld [vmem:[%s3871_s26] sm:$0xff] }
 0x235   : > { %v1560_v39 = vpack.c.bf16 %v1556_v35, %v1556_v35  ;;  %v1561_v52 = vpack.c.bf16 %v1557_v41, %v1557_v41 }
 0x240   : > { %v854_v11 = vpop.f32.mrb[4].mxu0  ;;  %v918_v12 = vpop.f32.mrb[4].mxu1 }
 0x241   : > { %v2774_v13 = vpop.f32.mrb[5].mxu0  ;;  %v2786_v14 = vpop.f32.mrb[5].mxu1  ;;  %v855_v55 = vadd.f32 %v2533_v44, %v854_v11  ;;  %v919_v56 = vadd.f32 %v2534_v45, %v918_v12 }
 0x242   : > { %v857_v15 = vpop.f32.mrb[6].mxu0  ;;  %v921_v16 = vpop.f32.mrb[6].mxu1 }
 0x243   : > { %v2775_v17 = vpop.f32.mrb[7].mxu0  ;;  %v2787_v18 = vpop.f32.mrb[7].mxu1  ;;  %v1558_v63 = vmul.f32 0.25, %v855_v55  ;;  %v1559_v0 = vmul.f32 0.25, %v919_v56 }
 0x245   : > { %v1562_v1 = vpack.c.bf16 %v1558_v63, %v1558_v63  ;;  %v1563_v2 = vpack.c.bf16 %v1559_v0, %v1559_v0 }
 0x250   : > { %v1042_v21 = vpop.f32.mrb[8].mxu0  ;;  %v1106_v22 = vpop.f32.mrb[8].mxu1 }
 0x251   : > { %v1043_v23 = vadd.f32 %v2555_v19, %v1042_v21  ;;  %v2798_v24 = vpop.f32.mrb[9].mxu0  ;;  %v2810_v25 = vpop.f32.mrb[9].mxu1  ;;  %v1107_v34 = vadd.f32 %v2556_v26, %v1106_v22  ;;  %v2582_v21 = vld [vmem:[%s3844_s9 + $0x3] ss:$0 sm:$0xff] }
 0x252   : > { %v1045_v27 = vpop.f32.mrb[10].mxu0  ;;  %v1109_v28 = vpop.f32.mrb[10].mxu1 }
 0x253   : > { %v1564_v30 = vpack.c.bf16 %v1043_v23, %v1043_v23  ;;  %v2799_v31 = vpop.f32.mrb[11].mxu0  ;;  %v2811_v32 = vpop.f32.mrb[11].mxu1  ;;  %v1565_v37 = vpack.c.bf16 %v1107_v34, %v1107_v34 }
 0x255   : > { %v1574_v33 = vsel %vm1569_vm2, %v1564_v30, 0  ;;  %v1620_v40 = vsel %vm1569_vm2, %v1565_v37, 0 }
 0x256   : > { %2885 = vmatpush3.bf16.xpose.msra.mxu0 %v1574_v33 }
 0x257   : > { %2890 = vmatprep.subr.bf16.mxu0 %v3182_v9 }
 0x25d   : > { %2887 = vmatmul.mubr.msk.bf16.vlgmr.msra.gmra.mrb[24].mxu0 %vm1569_vm2, %v1560_v39 }
 0x25e   : > { %2891 = vmatpush3.bf16.xpose.msra.mxu0 %v1620_v40  ;;  %2892 = vmatprep.mubr.msk.bf16.mxu0 %vm3183_vm1, %v3182_v9 }
 0x25f   : > { %2896 = vmatprep.subr.bf16.mxu0 %v3182_v9 }
 0x260   : > { %v1170_v46 = vpop.f32.mrb[12].mxu0  ;;  %v1234_v47 = vpop.f32.mrb[12].mxu1 }
 0x261   : > { %v1171_v48 = vadd.f32 %v2557_v42, %v1170_v46  ;;  %v1235_v49 = vadd.f32 %v2558_v43, %v1234_v47  ;;  %v2822_v50 = vpop.f32.mrb[13].mxu0  ;;  %v2834_v51 = vpop.f32.mrb[13].mxu1 }
 0x262   : > { %v1173_v53 = vpop.f32.mrb[14].mxu0  ;;  %v1237_v54 = vpop.f32.mrb[14].mxu1 }
 0x263   : > { %v1566_v57 = vpack.c.bf16 %v1171_v48, %v1171_v48  ;;  %v1567_v58 = vpack.c.bf16 %v1235_v49, %v1235_v49  ;;  %v2823_v59 = vpop.f32.mrb[15].mxu0  ;;  %v2835_v60 = vpop.f32.mrb[15].mxu1 }
 0x265   : > { %v1666_v61 = vsel %vm1569_vm2, %v1566_v57, 0  ;;  %v1712_v62 = vsel %vm1569_vm2, %v1567_v58, 0  ;;  %2893 = vmatmul.mubr.msk.bf16.vlgmr.msra.gmra.mrb[28].mxu0 %vm1569_vm2, %v1561_v52 }
 0x266   : > { %2897 = vmatpush3.bf16.xpose.msra.mxu0 %v1666_v61  ;;  %2903 = vmatpush3.bf16.xpose.msra.mxu1 %v1712_v62 }
 0x267   : > { %2898 = vmatprep.mubr.msk.bf16.mxu0 %vm3183_vm1, %v3182_v9  ;;  %2908 = vmatprep.subr.bf16.mxu0 %v3182_v9 }
 0x268   : > { %2914 = vmatprep.subr.bf16.mxu1 %v3182_v9 }
 0x26d   : > { %2899 = vmatmul.mubr.msk.bf16.vlgmr.msra.gmra.mrb[32].mxu0 %vm1569_vm2, %v1562_v1  ;;  %2905 = vmatmul.mubr.msk.bf16.vlgmr.msra.gmra.mrb[24].mxu1 %vm1569_vm2, %v1563_v2 }
 0x26e   : > { %2910 = vmatprep.mubr.msk.bf16.mxu0 %vm3183_vm1, %v3182_v9  ;;  %2916 = vmatprep.mubr.msk.bf16.mxu1 %vm3183_vm1, %v3182_v9 }
 0x270   : > { %v1358_v5 = vpop.f32.mrb[16].mxu0  ;;  %v1422_v6 = vpop.f32.mrb[16].mxu1 }
 0x271   : > { %v1359_v7 = vadd.f32 %v2579_v3, %v1358_v5  ;;  %v1423_v8 = vadd.f32 %v2580_v4, %v1422_v6  ;;  %v2846_v10 = vpop.f32.mrb[17].mxu0  ;;  %v2858_v11 = vpop.f32.mrb[17].mxu1 }
 0x272   : > { %v1361_v12 = vpop.f32.mrb[18].mxu0  ;;  %v1425_v13 = vpop.f32.mrb[18].mxu1 }
 0x273   : > { %v1803_v14 = vpack.c.bf16 %v1359_v7, %v1359_v7  ;;  %v1804_v15 = vpack.c.bf16 %v1423_v8, %v1423_v8  ;;  %v2847_v16 = vpop.f32.mrb[19].mxu0  ;;  %v2859_v17 = vpop.f32.mrb[19].mxu1 }
 0x275   : > { %v1812_v18 = vsel %vm1810_vm3, %v1803_v14, 0  ;;  %v1858_v19 = vsel %vm1810_vm3, %v1804_v15, 0 }
 0x276   : > { %2909 = vmatpush3.bf16.msra.mxu0 %v1812_v18  ;;  %2915 = vmatpush3.bf16.msra.mxu1 %v1858_v19 }
 0x277   : > { %2920 = vmatprep.subr.bf16.mxu0 %v3182_v9  ;;  %2926 = vmatprep.subr.bf16.mxu1 %v3182_v9 }
 0x280   : > { %v1486_v22 = vpop.f32.mrb[20].mxu0  ;;  %v1550_v23 = vpop.f32.mrb[20].mxu1 }
 0x281   : > { %v1487_v24 = vadd.f32 %v2581_v20, %v1486_v22  ;;  %v1551_v25 = vadd.f32 %v2582_v21, %v1550_v23  ;;  %v2870_v26 = vpop.f32.mrb[21].mxu0  ;;  %v2882_v27 = vpop.f32.mrb[21].mxu1 }
 0x282   : > { %v1489_v28 = vpop.f32.mrb[22].mxu0  ;;  %v1553_v29 = vpop.f32.mrb[22].mxu1 }
 0x283   : > { %v1805_v30 = vpack.c.bf16 %v1487_v24, %v1487_v24  ;;  %v1806_v31 = vpack.c.bf16 %v1551_v25, %v1551_v25  ;;  %v2871_v32 = vpop.f32.mrb[23].mxu0  ;;  %v2883_v33 = vpop.f32.mrb[23].mxu1 }
 0x285   : > { %v3653_v34 = vsel %vm1810_vm3, %v1805_v30, 0  ;;  %v3656_v35 = vsel %vm1810_vm3, %v1806_v31, 0 }
 0x330   : > { %v1610_v37 = vpop.f32.mrb[24].mxu0 }
 0x331   : > { %v1611_v38 = vadd.f32 %v1610_v37, %v1568_v36  ;;  %v2888_v39 = vpop.f32.mrb[25].mxu0  ;;  %v3079_v37 = vld [vmem:[%s3845_s10 + $0x10] sm:$0xff]  }
 0x332   : > { %v1613_v40 = vpop.f32.mrb[26].mxu0 }
 0x333   : > { %v2889_v41 = vpop.f32.mrb[27].mxu0  ;;  %v1755_v42 = vsel %vm1754_vm4, %v1611_v38, -inf }
 0x334   : > { %1756 = vmax.xlane.f32.xlu1 %v1755_v42 }
 0x338   : > { %v1656_v43 = vpop.f32.mrb[28].mxu0 }
 0x339   : > { %v1657_v44 = vadd.f32 %v1656_v43, %v1568_v36  ;;  %v2894_v45 = vpop.f32.mrb[29].mxu0  ;;  %v3080_v43 = vld [vmem:[%s3845_s10 + $0x18] sm:$0xff]  }
 0x33a   : > { %v1659_v46 = vpop.f32.mrb[30].mxu0 }
 0x33b   : > { %v2895_v47 = vpop.f32.mrb[31].mxu0  ;;  %v1758_v48 = vsel %vm1754_vm4, %v1657_v44, -inf }
 0x33c   : > { %1759 = vmax.xlane.f32.xlu1 %v1758_v48 }
 0x340   : > { %v1702_v49 = vpop.f32.mrb[32].mxu0  ;;  %v1748_v50 = vpop.f32.mrb[24].mxu1 }
 0x341   : > { %v1703_v51 = vadd.f32 %v1702_v49, %v1568_v36  ;;  %v1749_v52 = vadd.f32 %v1748_v50, %v1568_v36  ;;  %v2900_v53 = vpop.f32.mrb[33].mxu0  ;;  %v2906_v54 = vpop.f32.mrb[25].mxu1 }
 0x342   : > { %v1705_v55 = vpop.f32.mrb[34].mxu0  ;;  %v1751_v56 = vpop.f32.mrb[26].mxu1 }
 0x343   : > { %v2901_v57 = vpop.f32.mrb[35].mxu0  ;;  %v2907_v58 = vpop.f32.mrb[27].mxu1  ;;  %v1764_v59 = vsel %vm1754_vm4, %v1749_v52, -inf  ;;  %v1761_v60 = vsel %vm1754_vm4, %v1703_v51, -inf }
 0x344   : > { %1765 = vmax.xlane.f32.xlu1 %v1764_v59  ;;  %1762 = vmax.xlane.f32.xlu0 %v1761_v60 }
 0x3c1   : > { %v1757_v61 = vpop.xlane.xlu1 %1756 }
 0x3c2   : > { %v1767_v62 = vsub.f32 %v1611_v38, %v1757_v61 }
 0x3c4   : > { %v1771_v63 = vmul.f32 1.442695, %v1767_v62 }
 0x3c6   : > { %3095 = vpow2.f32 %v1771_v63 }
 0x3c9   : > { %v1760_v0 = vpop.xlane.xlu1 %1759 }
 0x3ca   : > { %v1768_v1 = vsub.f32 %v1657_v44, %v1760_v0 }
 0x3cc   : > { %v1773_v2 = vmul.f32 1.442695, %v1768_v1 }
 0x3ce   : > { %3097 = vpow2.f32 %v1773_v2 }
 0x3d0   : > { %v3096_v3 = vpop.eup %3095 }
 0x3d1   : > { %v1766_v4 = vpop.xlane.xlu1 %1765  ;;  %v1763_v5 = vpop.xlane.xlu0 %1762  ;;  %v1779_v6 = vsel %vm1754_vm4, %v3096_v3, 0.0 }
 0x3d2   : > { %v1770_v7 = vsub.f32 %v1749_v52, %v1766_v4  ;;  %v1769_v8 = vsub.f32 %v1703_v51, %v1763_v5  ;;  %1780 = vadd.xlane.f32.xlu0 %v1779_v6 }
 0x3d4   : > { %v1777_v10 = vmul.f32 1.442695, %v1770_v7  ;;  %v1775_v11 = vmul.f32 1.442695, %v1769_v8 }
 0x3d6   : > { %3099 = vpow2.f32 %v1777_v10 }
 0x3d7   : > { %3101 = vpow2.f32 %v1775_v11 }
 0x3d8   : > { %v3098_v12 = vpop.eup %3097 }
 0x3d9   : > { %v1782_v13 = vsel %vm1754_vm4, %v3098_v12, 0.0 }
 0x3da   : > { %1783 = vadd.xlane.f32.xlu1 %v1782_v13 }
 0x3e0   : > { %v3100_v14 = vpop.eup %3099 }
 0x3e1   : > { %v3102_v15 = vpop.eup %3101  ;;  %v1788_v16 = vsel %vm1754_vm4, %v3100_v14, 0.0 }
 0x3e2   : > { %1789 = vadd.xlane.f32.xlu1 %v1788_v16  ;;  %v1785_v17 = vsel %vm1754_vm4, %v3102_v15, 0.0  ;;  %v2619_v16 = vld [vmem:[%s3846_s11] ss:$0 sm:$0xff] }
 0x3e3   : > { %1786 = vadd.xlane.f32.xlu0 %v1785_v17 }
 0x45f   : > { %v1781_v18 = vpop.xlane.xlu0 %1780 }
 0x460   : > { %3103 = vrcp.f32 %v1781_v18 }
 0x467   : > { %v1784_v19 = vpop.xlane.xlu1 %1783 }
 0x468   : > { %3105 = vrcp.f32 %v1784_v19 }
 0x46a   : > { %v3104_v20 = vpop.eup %3103 }
 0x46b   : > { %v1795_v21 = vmul.f32 %v3104_v20, %v3096_v3  ;;  %v3117_v20 = vld [vmem:[%s3333_s21] sm:$0xff]  ;;  %s3184_s21 = smov [#allocation2]  }
 0x46c   : > { %s3122_s22 = sshll.u32 %s3184_s21, 4  ;;  %s3123_s22 = int_to_ptr.vmem [resolvable:$false] %s3122_s22 }
 0x46d   : > { %v1799_v22 = vpack.c.bf16 %v1795_v21, %v1795_v21  ;;  %s3124_s3 = scalar_lea.vmem %s3123_s22, 256  ;;  %p3125_p0 = scmp.lt.s32.totalorder %s3794_s29, %s3123_s22 }
 0x46e   : > { %p3126_p1 = scmp.lt.s32.totalorder %s3124_s3, %s3118_s19 }
 0x46f   : > { %v1790_v23 = vpop.xlane.xlu1 %1789  ;;  %2911 = vmatmul.mubr.msk.bf16.vlgmr.msra.gmra.mrb[36].mxu0 %vm1754_vm4, %v1799_v22 }
 0x470   : > { %3107 = vrcp.f32 %v1790_v23  ;;  %2921 = vmatpush3.bf16.msra.mxu0 %v3653_v34  ;;  %v1787_v24 = vpop.xlane.xlu0 %1786  ;;  %2922 = vmatprep.mubr.msk.bf16.mxu0 %vm3183_vm1, %v3182_v9  ;;  %v3077_v34 = vld [vmem:[%s3845_s10] sm:$0xff]   ;;  %p3127_p2 = por %p3126_p1, %p3125_p0 }
 0x471   : > { %3109 = vrcp.f32 %v1787_v24  ;;  %2932 = vmatprep.subr.bf16.mxu0 %v3182_v9 }
 0x472   : > { %v3106_v25 = vpop.eup %3105  ;;  %p3128_p3 = pnand %p3127_p2, %p3121_p13 }
 0x473   : > { %v1796_v26 = vmul.f32 %v3106_v25, %v3098_v12 }
 0x475   : > { %v1800_v27 = vpack.c.bf16 %v1796_v26, %v1796_v26 }
 0x477   : > { %2917 = vmatmul.mubr.msk.bf16.vlgmr.msra.gmra.mrb[28].mxu1 %vm1754_vm4, %v1800_v27 }
 0x478   : > { %2927 = vmatpush3.bf16.msra.mxu1 %v3656_v35  ;;  %2928 = vmatprep.mubr.msk.bf16.mxu1 %vm3183_vm1, %v3182_v9  ;;  %v3078_v35 = vld [vmem:[%s3845_s10 + $0x8] sm:$0xff]  }
 0x479   : > { %2938 = vmatprep.subr.bf16.mxu1 %v3182_v9 }
 0x47a   : > { %v3108_v28 = vpop.eup %3107 }
 0x47b   : > { %v3110_v29 = vpop.eup %3109  ;;  %v1798_v30 = vmul.f32 %v3108_v28, %v3100_v14  ;;  %v3081_v28 = vld [vmem:[%s3849_s14] sm:$0xff]  }
 0x47c   : > { %v1797_v31 = vmul.f32 %v3110_v29, %v3102_v15  ;;  %v3082_v29 = vld [vmem:[%s3849_s14 + $0x8] sm:$0xff]  }
 0x47d   : > { %v1802_v32 = vpack.c.bf16 %v1798_v30, %v1798_v30  ;;  %v3083_v30 = vld [vmem:[%s3849_s14 + $0x10] sm:$0xff]  }
 0x47e   : > { %v1801_v33 = vpack.c.bf16 %v1797_v31, %v1797_v31  ;;  %v3084_v31 = vld [vmem:[%s3849_s14 + $0x18] sm:$0xff]  }
 0x47f   : > { %2929 = vmatmul.mubr.msk.bf16.vlgmr.msra.gmra.mrb[32].mxu1 %vm1754_vm4, %v1802_v32 }
 0x480   : > { %2923 = vmatmul.mubr.msk.bf16.vlgmr.msra.gmra.mrb[40].mxu0 %vm1754_vm4, %v1801_v33  ;;  %2940 = vmatprep.mubr.msk.bf16.mxu1 %vm3183_vm1, %v3182_v9 }
 0x481   : > { %2934 = vmatprep.mubr.msk.bf16.mxu0 %vm3183_vm1, %v3182_v9  ;;  %2933 = vmatpush3.bf16.msra.mxu0 %v3077_v34 }
 0x482   : > { %2944 = vmatprep.subr.bf16.mxu0 %v3182_v9  ;;  %2939 = vmatpush3.bf16.msra.mxu1 %v3078_v35 }
 0x483   : > { %2950 = vmatprep.subr.bf16.mxu1 %v3182_v9 }
 0x542   : > { %v1848_v36 = vpop.f32.mrb[36].mxu0 }
 0x543   : > { %v1992_v38 = vpack.c.bf16 %v1848_v36, %v1848_v36  ;;  %v2912_v39 = vpop.f32.mrb[37].mxu0  ;;  %v2620_v36 = vld [vmem:[%s3847_s12] ss:$0 sm:$0xff] }
 0x544   : > { %v1851_v40 = vpop.f32.mrb[38].mxu0 }
 0x545   : > { %v2913_v41 = vpop.f32.mrb[39].mxu0  ;;  %2935 = vmatmul.mubr.msk.bf16.vlgmr.msra.gmra.mrb[44].mxu0 %vm1569_vm2, %v1992_v38  ;;  %v2621_v38 = vld [vmem:[%s3848_s13] ss:$0 sm:$0xff] }
 0x546   : > { %2945 = vmatpush3.bf16.msra.mxu0 %v3079_v37  ;;  %2946 = vmatprep.mubr.msk.bf16.mxu0 %vm3183_vm1, %v3182_v9 }
 0x547   : > { %2956 = vmatprep.subr.bf16.mxu0 %v3182_v9 }
 0x54a   : > { %v1894_v42 = vpop.f32.mrb[28].mxu1 }
 0x54b   : > { %v1993_v44 = vpack.c.bf16 %v1894_v42, %v1894_v42  ;;  %v2918_v45 = vpop.f32.mrb[29].mxu1  ;;  %v3085_v42 = vld [vmem:[%s3851_s16] sm:$0xff]  }
 0x54c   : > { %v1897_v46 = vpop.f32.mrb[30].mxu1  ;;  %v3088_v45 = vld [vmem:[%s3851_s16 + $0x18] sm:$0xff]  }
 0x54d   : > { %v2919_v47 = vpop.f32.mrb[31].mxu1  ;;  %2941 = vmatmul.mubr.msk.bf16.vlgmr.msra.gmra.mrb[36].mxu1 %vm1569_vm2, %v1993_v44  ;;  %v3087_v44 = vld [vmem:[%s3851_s16 + $0x10] sm:$0xff]   ;;  %v3089_v46 = vld [vmem:[%s3851_s16 + $0x20] sm:$0xff]  }
 0x54e   : > { %2951 = vmatpush3.bf16.msra.mxu1 %v3080_v43  ;;  %2952 = vmatprep.mubr.msk.bf16.mxu1 %vm3183_vm1, %v3182_v9  ;;  %v3086_v43 = vld [vmem:[%s3851_s16 + $0x8] sm:$0xff]  }
 0x54f   : > { %2968 = vmatprep.subr.bf16.mxu1 %v3182_v9  ;;  %v3090_v47 = vld [vmem:[%s3851_s16 + $0x28] sm:$0xff]  }
 0x552   : > { %v1986_v48 = vpop.f32.mrb[32].mxu1 }
 0x553   : > { %v1940_v49 = vpop.f32.mrb[40].mxu0  ;;  %v1995_v50 = vpack.c.bf16 %v1986_v48, %v1986_v48  ;;  %v2930_v51 = vpop.f32.mrb[33].mxu1  ;;  %v3091_v48 = vld [vmem:[%s3851_s16 + $0x30] sm:$0xff]  }
 0x554   : > { %v1994_v52 = vpack.c.bf16 %v1940_v49, %v1940_v49  ;;  %v2924_v53 = vpop.f32.mrb[41].mxu0  ;;  %v1989_v54 = vpop.f32.mrb[34].mxu1  ;;  %v3092_v49 = vld [vmem:[%s3851_s16 + $0x38] sm:$0xff]  }
 0x555   : > { %v1943_v55 = vpop.f32.mrb[42].mxu0  ;;  %v2931_v56 = vpop.f32.mrb[35].mxu1  ;;  %2953 = vmatmul.mubr.msk.bf16.vlgmr.msra.gmra.mrb[40].mxu1 %vm1569_vm2, %v1995_v50  ;;  %v2622_v50 = vld [vmem:[%s3850_s15] ss:$0 sm:$0xff] }
 0x556   : > { %v2925_v57 = vpop.f32.mrb[43].mxu0  ;;  %2947 = vmatmul.mubr.msk.bf16.vlgmr.msra.gmra.mrb[48].mxu0 %vm1569_vm2, %v1994_v52  ;;  %2984 = vmatprep.mubr.msk.bf16.mxu1 %vm3183_vm1, %v3182_v9 }
 0x557   : > { %2964 = vmatprep.mubr.msk.bf16.mxu0 %vm3183_vm1, %v3182_v9  ;;  %2957 = vmatpush3.bf16.msra.mxu0 %v3081_v28 }
 0x558   : > { %2958 = vmatprep.subr.bf16.mxu0 %v3182_v9  ;;  %2969 = vmatpush3.bf16.msra.mxu1 %v3085_v42 }
 0x559   : > { %2970 = vmatprep.subr.bf16.mxu1 %v3182_v9 }
 0x55b   : > { %2959 = vmatpush3.bf16.msra.mxu0 %v3082_v29 }
 0x55c   : > { %2960 = vmatprep.subr.bf16.mxu0 %v3182_v9  ;;  %2971 = vmatpush3.bf16.msra.mxu1 %v3086_v43 }
 0x55d   : > { %2972 = vmatprep.subr.bf16.mxu1 %v3182_v9 }
 0x55f   : > { %2961 = vmatpush3.bf16.msra.mxu0 %v3083_v30 }
 0x560   : > { %2962 = vmatprep.subr.bf16.mxu0 %v3182_v9  ;;  %2973 = vmatpush3.bf16.msra.mxu1 %v3087_v44 }
 0x561   : > { %2974 = vmatprep.subr.bf16.mxu1 %v3182_v9 }
 0x563   : > { %2963 = vmatpush3.bf16.msra.mxu0 %v3084_v31 }
 0x564   : > { %2975 = vmatpush3.bf16.msra.mxu1 %v3088_v45 }
 0x565   : > { %2976 = vmatprep.subr.bf16.mxu1 %v3182_v9 }
 0x568   : > { %2977 = vmatpush3.bf16.msra.mxu1 %v3089_v46 }
 0x569   : > { %2978 = vmatprep.subr.bf16.mxu1 %v3182_v9 }
 0x56c   : > { %2979 = vmatpush3.bf16.msra.mxu1 %v3090_v47 }
 0x56d   : > { %2980 = vmatprep.subr.bf16.mxu1 %v3182_v9 }
 0x570   : > { %2981 = vmatpush3.bf16.msra.mxu1 %v3091_v48 }
 0x571   : > { %2982 = vmatprep.subr.bf16.mxu1 %v3182_v9 }
 0x574   : > { %2983 = vmatpush3.bf16.msra.mxu1 %v3092_v49 }
 0x618   : > { %v2047_v58 = vpop.f32.mrb[44].mxu0 }
 0x619   : > { %v2936_v59 = vpop.f32.mrb[45].mxu0  ;;  %v2200_v63 = vsel %vm575_vm0, %v2047_v58, 0.0 }
 0x61a   : > { %v2050_v60 = vpop.f32.mrb[46].mxu0 }
 0x61b   : > { %v2937_v61 = vpop.f32.mrb[47].mxu0 }
 0x620   : > { %v2096_v62 = vpop.f32.mrb[36].mxu1 }
 0x621   : > { %v2201_v0 = vsel %vm575_vm0, %v2096_v62, 0.0  ;;  %v2942_v1 = vpop.f32.mrb[37].mxu1  ;;  %v2629_v62 = vld [vmem:[%s3852_s17] ss:$0 sm:$0xff] }
 0x622   : > { %v2202_v2 = vadd.f32 %v2201_v0, %v2200_v63  ;;  %v2099_v3 = vpop.f32.mrb[38].mxu1 }
 0x623   : > { %v2943_v4 = vpop.f32.mrb[39].mxu1 }
 0x628   : > { %v2194_v5 = vpop.f32.mrb[40].mxu1 }
 0x629   : > { %v2145_v6 = vpop.f32.mrb[48].mxu0  ;;  %v2954_v7 = vpop.f32.mrb[41].mxu1  ;;  %v2205_v15 = vsel %vm575_vm0, %v2194_v5, 0.0 }
 0x62a   : > { %v2203_v8 = vsel %vm575_vm0, %v2145_v6, 0.0  ;;  %v2948_v10 = vpop.f32.mrb[49].mxu0  ;;  %v2197_v11 = vpop.f32.mrb[42].mxu1 }
 0x62b   : > { %v2204_v12 = vadd.f32 %v2203_v8, %v2202_v2  ;;  %v2148_v13 = vpop.f32.mrb[50].mxu0  ;;  %v2955_v14 = vpop.f32.mrb[43].mxu1 }
 0x62c   : > { %v2949_v17 = vpop.f32.mrb[51].mxu0 }
 0x62d   : > { %v2206_v18 = vadd.f32 %v2205_v15, %v2204_v12 }
 0x62f   : > { %v2214_v19 = vadd.f32 %v2619_v16, %v2206_v18 }
 0x631   : > { %v3721_v21 = vadd.f32 %v3117_v20, %v2214_v19 }
 0x633   : > { %v2218_v22 = vsel %vm575_vm0, %v3721_v21, 0.0 }
 0x634   : > { %2219 = vadd.xlane.f32.xlu0 %v2218_v22 }
 0x6c1   : > { %v2220_v23 = vpop.xlane.xlu0 %2219 }
 0x6c2   : > { %v2221_v24 = vmul.f32 0.015625, %v2220_v23 }
 0x6c4   : > { %v2222_v25 = vsub.f32 %v3721_v21, %v2221_v24 }
 0x6c6   : > { %v2223_v26 = vmul.f32 %v2222_v25, %v2222_v25 }
 0x6c8   : > { %v2224_v27 = vsel %vm575_vm0, %v2223_v26, 0.0 }
 0x6c9   : > { %2225 = vadd.xlane.f32.xlu1 %v2224_v27 }
 0x756   : > { %v2226_v32 = vpop.xlane.xlu1 %2225 }
 0x757   : > { %v2227_v33 = vmul.f32 0.015625, %v2226_v32 }
 0x759   : > { %v2228_v34 = vadd.f32 1e-05, %v2227_v33 }
 0x75b   : > { %3111 = vrsqrt.f32 %v2228_v34 }
 0x765   : > { %v3112_v35 = vpop.eup %3111 }
 0x766   : > { %v2230_v37 = vmul.f32 %v3112_v35, %v2222_v25 }
 0x768   : > { %v2237_v39 = vmul.f32 %v2620_v36, %v2230_v37 }
 0x76a   : > { %v2244_v40 = vadd.f32 %v2621_v38, %v2237_v39 }
 0x76c   : > { %v2245_v41 = vpack.c.bf16 %v2244_v40, %v2244_v40 }
 0x76e   : > { %2965 = vmatmul.mubr.msk.bf16.vlgmr.msra.gmra.mrb[52].mxu0 %vm575_vm0, %v2245_v41 }
 0x841   : > { %v2322_v51 = vpop.f32.mrb[52].mxu0 }
 0x842   : > { %v2323_v52 = vadd.f32 %v2622_v50, %v2322_v51  ;;  %v2966_v53 = vpop.f32.mrb[53].mxu0 }
 0x843   : > { %v2325_v54 = vpop.f32.mrb[54].mxu0 }
 0x844   : > { %v2628_v55 = vmul.f32 -1.702, %v2323_v52  ;;  %v2967_v56 = vpop.f32.mrb[55].mxu0 }
 0x846   : > { %v2330_v57 = vmul.f32 1.442695, %v2628_v55 }
 0x848   : > { %3113 = vpow2.f32 %v2330_v57 }
 0x852   : > { %v3114_v9 = vpop.eup %3113 }
 0x853   : > { %v2332_v58 = vadd.f32 1.0, %v3114_v9 }
 0x855   : > { %3115 = vrcp.f32 %v2332_v58 }
 0x85f   : > { %v3116_v59 = vpop.eup %3115 }
 0x860   : > { %v2335_v60 = vmul.f32 %v3116_v59, %v2323_v52 }
 0x862   : > { %v2336_v61 = vpack.c.bf16 %v2335_v60, %v2335_v60 }
 0x864   : > { %2985 = vmatmul.mubr.bf16.vlgmr.msra.gmra.mrb[44].mxu1 %v2336_v61 }
 0x937   : > { %v2442_v63 = vpop.f32.mrb[44].mxu1 }
 0x938   : > { %v2443_v0 = vadd.f32 %v2629_v62, %v2442_v63  ;;  %v2986_v1 = vpop.f32.mrb[45].mxu1 }
 0x939   : > { %v2445_v2 = vpop.f32.mrb[46].mxu1 }
 0x93a   : > { %v2448_v3 = vadd.f32 %v2443_v0, %v3721_v21  ;;  %v2987_v4 = vpop.f32.mrb[47].mxu1 }
 0x93c   : > { %2449 = vst.msk [vmem:[%s566_s1] sm:$0xff] %vm575_vm0, %v2448_v3 }
 0x93d   : > { %3131 = shalt.err (!%p3128_p3)
}
 0x93e   : > { %s3132_s25 = scalar_lea.hbm %s3792_s23, 128  ;;  %s3136_s24 = scalar_lea.hbm %s3853_s18, 256 }
 0x93f   : > { %p3133_p4 = scmp.ne.s32.totalorder %s3792_s23, %s3132_s25  ;;  %p3137_p9 = scmp.lt.u32.totalorder %s3792_s23, %s3853_s18 }
 0x940   : > { %p3138_p10 = scmp.lt.u32.totalorder %s3136_s24, %s3132_s25  ;;  %p3140_p12 = scmp.lt.u32.totalorder %s3132_s25, %s3792_s23 }
 0x941   : > { %p3134_p7 = pnand %p3133_p4, %p3318_p5 }
 0x942   : > { %p3139_p11 = por %p3138_p10, %p3137_p9 }
 0x943   : > { %p3135_p8 = pneg %p3134_p7 }
 0x944   : > { %p3141_p13 = por %p3140_p12, %p3139_p11 }
 0x946   : > { %p3142_p0 = pnand %p3141_p13, %p3135_p8 }
 0x948   : > { %3145 = shalt.err (!%p3142_p0)
}
 0x949   : > { %2988 = dma.vmem_to_hbm [thread:$0]  (%p3318_p5), %s3794_s29, 128, %s3792_s23, %s2451_s0  }
 0x94a PF: > { %p2994_p1 = scmp.ge.s32.totalorder %s3180_s30, 2  ;;  %s2476_s19 = sand.u32 1, %s3168_s27  }
 0x94b   : > { %s2477_s22 = scalar_lea.sflag [#allocation3], %s2476_s19 }
 0x94c   : > { %p2991_p2 = pnand %p2994_p1, %p3322_p6 }
 0x94e   : > { %3163 = dma.done.wait (!%p2991_p2), %s2477_s22, 128  }
 0x94f   : > { %3165 = vsyncadd (!%p2991_p2), %s2477_s22, 4294967168  ;;  %s3873_s30 = sld [smem:[#allocation6_spill]]  ;;  %s3874_s25 = sld [smem:[#allocation5_spill]] }
 0x950   : > { %s3875_s29 = sld [smem:[#allocation7_spill]]  ;;  %s3876_s27 = smov %s3172_s28 }
 0x955   : > { %p28_p3 = scmp.ge.s32.totalorder %s3873_s30, 4   ;;  %s3877_s28 = smov %s3874_s25 }
 0x957   :  { %30 = sbr.rel (!%p28_p3) target bundleno = 8 (0x8), region = 127 }
 0x95e   :  { %2482 = vsyncpa [#allocation3], 1 }
 0x95f   :  { %2484 = vsyncpa [#allocation3 + $0x1], 1 }

</bundles_post_ra>
